<compile_context>
chip_gen: v5e
topology: v5e:2x2
jax: 0.10.0
libtpu: 0.0.40
codegen_flags: <defaults>
</compile_context>

<pallas_src>
import functools

import jax
import jax.numpy as jnp
from jax.experimental import pallas as pl
from jax.experimental.pallas import tpu as pltpu


def _relu6(v):
    return jnp.clip(v, 0.0, 6.0)


def mbconv_kernel(x_ref, w1_ref, wd_ref, w2_ref, b_ref, o_ref, *,
                  H, W, Cin, hidden, Cout, K, stride, padding, use_residual):
    """One batch image per grid step.  Fuses: block-diag expand matmul (+BN1+ReLU6,
    im2col along W, column padding folded in), depthwise KxK (+BN2+ReLU6),
    block-diag project matmul (+BN3), residual add."""
    Hp = H + 2 * padding
    Wp = W + 2 * padding
    Ho = (Hp - K) // stride + 1
    Wo = (Wp - K) // stride + 1
    Hs1 = Hp - K + 1                       # stride-1 row count of the depthwise output
    B1 = K * Wo * hidden
    B2 = Wo * hidden
    B3 = Wo * Cout
    f32 = jnp.float32

    x2 = x_ref[0].astype(f32)                                      # (H, W*Cin) lane-dense load

    # ---- 1x1 expand as a block-diagonal im2col matmul (BN1 scale + col zero-pad folded) ----
    b1 = b_ref[:, 0:B1]                                            # (1, K*Wo*hidden), 0 at pad cols
    y = jnp.dot(x2, w1_ref[...], preferred_element_type=f32)       # (H, K*Wo*hidden)
    y = _relu6(y + b1)

    # ---- row zero padding as a value (sublane-axis concat only) ----
    if padding > 0:
        zr = jnp.zeros((padding, B1), f32)
        y = jnp.concatenate([zr, y, zr], axis=0)                   # (Hp, K*Wo*hidden)

    # ---- depthwise KxK conv (columns already strided/shifted via the expand weight) ----
    acc = jnp.zeros((Hs1, B2), f32)
    for kw in range(K):
        col = y[:, kw * B2:(kw + 1) * B2]                          # (Hp, Wo*hidden), aligned slice
        for kh in range(K):
            tap = wd_ref[pl.ds(kh * K + kw, 1), :]                 # (1, Wo*hidden), s2 folded in
            acc = acc + col[kh:kh + Hs1, :] * tap

    if stride > 1:
        # Statically subsample output rows through the MXU with a 0/1 selection matrix
        # (avoids strided slices on sublane/lane dims).
        r_idx = jax.lax.broadcasted_iota(jnp.int32, (Ho, Hs1), 1)
        o_idx = jax.lax.broadcasted_iota(jnp.int32, (Ho, Hs1), 0)
        sel = (r_idx == stride * o_idx).astype(f32)                # (Ho, Hs1)
        acc = jnp.dot(sel, acc, preferred_element_type=f32)        # (Ho, Wo*hidden)

    b2 = b_ref[:, B1:B1 + B2]
    h2 = _relu6(acc + b2)                                          # (Ho, Wo*hidden)

    # ---- 1x1 project as a block-diagonal matmul (BN3 scale folded) + bias ----
    b3 = b_ref[:, B1 + B2:B1 + B2 + B3]
    out = jnp.dot(h2, w2_ref[...], preferred_element_type=f32) + b3   # (Ho, Wo*Cout)

    if use_residual:
        out = out + x2                                             # (H, W*Cin) == (Ho, Wo*Cout)

    o_ref[0] = out.astype(o_ref.dtype)                             # lane-dense store


def _fold_bn(bn, eps=1e-5):
    gamma, beta, mean, var = bn
    scale = gamma / jnp.sqrt(var + eps)
    bias = beta - mean * scale
    return scale, bias


def mbconv_forward(x_nchw, w1, wd, w2, bn1, bn2, bn3, *,
                   stride, kernel_size, padding):
    """Wrapper: NCHW in/out (PyTorch convention); kernel runs lane-packed."""
    N, Cin, H, W = x_nchw.shape
    hidden = w1.shape[0]
    Cout = w2.shape[0]
    K = kernel_size
    f32 = jnp.float32

    Hp, Wp = H + 2 * padding, W + 2 * padding
    Ho = (Hp - K) // stride + 1
    Wo = (Wp - K) // stride + 1
    # Matches the PyTorch module: stride==1 and multiple!=1 and in_ch==out_ch
    use_residual = (stride == 1) and (hidden != Cin) and (Cin == Cout)

    s1, b1 = _fold_bn(bn1)
    s2, b2 = _fold_bn(bn2)
    s3, b3 = _fold_bn(bn3)

    # Lane-dense input: flatten (W, Cin) onto the minor dim.
    x_flat = jnp.transpose(x_nchw, (0, 2, 3, 1)).reshape(N, H, W * Cin)

    # ---- expand weight: block-diagonal im2col-along-W, BN1 scale + stride + padding folded ----
    w1s = jnp.transpose(w1, (1, 0)) * s1[None, :]                  # (Cin, hidden)
    w_src = stride * jnp.arange(Wo)[None, :] + jnp.arange(K)[:, None] - padding   # (K, Wo)
    valid = (w_src >= 0) & (w_src < W)                             # (K, Wo)
    onehot = ((w_src[..., None] == jnp.arange(W)[None, None, :]) & valid[..., None]).astype(f32)
    # (K, Wo, W) x (Cin, hidden) -> (W, Cin, K, Wo, hidden) -> (W*Cin, K*Wo*hidden)
    w1bd = (onehot[:, :, :, None, None] * w1s[None, None, None, :, :])
    w1bd = jnp.transpose(w1bd, (2, 3, 0, 1, 4)).reshape(W * Cin, K * Wo * hidden)
    # Bias for the im2col'ed expand output: zero at padded column positions so ReLU6 keeps 0.
    b1_t = (valid.astype(f32)[:, :, None] * b1[None, None, :]).reshape(1, K * Wo * hidden)

    # ---- depthwise taps with BN2 scale folded, tiled Wo-fold (lane dense) ----
    wd_k = jnp.transpose(wd, (1, 2, 0)).reshape(K * K, hidden) * s2[None, :]   # (K*K, hidden)
    wdb = jnp.tile(wd_k, (1, Wo))                                              # (K*K, Wo*hidden)
    b2_t = jnp.tile(b2, Wo).reshape(1, Wo * hidden)

    # ---- project weight: block-diagonal, BN3 scale folded ----
    w2s = jnp.transpose(w2, (1, 0)) * s3[None, :]                  # (hidden, Cout)
    eye = jnp.eye(Wo, dtype=f32)
    w2bd = (eye[:, None, :, None] * w2s[None, :, None, :]).reshape(Wo * hidden, Wo * Cout)
    b3_t = jnp.tile(b3, Wo).reshape(1, Wo * Cout)

    # Single packed bias operand (one small DMA instead of several).
    bias_packed = jnp.concatenate([b1_t, b2_t, b3_t], axis=1)      # (1, B1+B2+B3)

    kernel = functools.partial(
        mbconv_kernel, H=H, W=W, Cin=Cin, hidden=hidden, Cout=Cout,
        K=K, stride=stride, padding=padding, use_residual=use_residual)

    def full_spec(shape):
        return pl.BlockSpec(shape, lambda n, _s=shape: (0,) * len(_s))

    out_flat = pl.pallas_call(
        kernel,
        out_shape=jax.ShapeDtypeStruct((N, Ho, Wo * Cout), x_nchw.dtype),
        grid_spec=pltpu.PrefetchScalarGridSpec(
            num_scalar_prefetch=0,
            grid=(N,),
            in_specs=[
                pl.BlockSpec((1, H, W * Cin), lambda n: (n, 0, 0)),
                full_spec((W * Cin, K * Wo * hidden)),
                full_spec((K * K, Wo * hidden)),
                full_spec((Wo * hidden, Wo * Cout)),
                full_spec((1, bias_packed.shape[1])),
            ],
            out_specs=pl.BlockSpec((1, Ho, Wo * Cout), lambda n: (n, 0, 0)),
        ),
        compiler_params=pltpu.CompilerParams(dimension_semantics=("parallel",)),
    )(x_flat, w1bd, wdb, w2bd, bias_packed)

    out_nhwc = out_flat.reshape(N, Ho, Wo, Cout)
    return jnp.transpose(out_nhwc, (0, 3, 1, 2))                   # back to NCHW


def reference_nchw(x, w1, wd, w2, bn1, bn2, bn3, *, stride, kernel_size, padding):
    """Pure-JAX reference of MBConvBlock.forward (inference-mode BN)."""
    eps = 1e-5
    relu6 = lambda v: jnp.clip(v, 0.0, 6.0)

    def bn(h, p):
        gamma, beta, mean, var = p
        scale = (gamma / jnp.sqrt(var + eps)).reshape(1, -1, 1, 1)
        bias = (beta - mean * gamma / jnp.sqrt(var + eps)).reshape(1, -1, 1, 1)
        return h * scale + bias

    dn = ("NCHW", "OIHW", "NCHW")
    hidden = w1.shape[0]
    in_ch, out_ch = x.shape[1], w2.shape[0]

    h = jax.lax.conv_general_dilated(
        x, w1.reshape(hidden, in_ch, 1, 1), (1, 1), "VALID",
        dimension_numbers=dn, precision=jax.lax.Precision.HIGHEST)
    h = relu6(bn(h, bn1))
    h = jax.lax.conv_general_dilated(
        h, wd.reshape(hidden, 1, kernel_size, kernel_size), (stride, stride),
        [(padding, padding), (padding, padding)], dimension_numbers=dn,
        feature_group_count=hidden, precision=jax.lax.Precision.HIGHEST)
    h = relu6(bn(h, bn2))
    h = jax.lax.conv_general_dilated(
        h, w2.reshape(out_ch, hidden, 1, 1), (1, 1), "VALID",
        dimension_numbers=dn, precision=jax.lax.Precision.HIGHEST)
    h = bn(h, bn3)
    if stride == 1 and hidden != in_ch and in_ch == out_ch:
        h = h + x
    return h


if __name__ == "__main__":
    # MBConvBlock(in_ch=8, out_ch=8, multiple=4, kernel_size=3, padding=1)
    N, Cin, H, W = 2, 8, 16, 16
    multiple, K, padding = 4, 3, 1
    Cout = 8
    hidden = Cin * multiple

    key = jax.random.PRNGKey(0)
    ks = jax.random.split(key, 8)

    x = jax.random.normal(ks[0], (N, Cin, H, W), jnp.float32)
    w1 = 0.2 * jax.random.normal(ks[1], (hidden, Cin), jnp.float32)   # torch: (hidden,Cin,1,1)
    wd = 0.2 * jax.random.normal(ks[2], (hidden, K, K), jnp.float32)  # torch: (hidden,1,K,K)
    w2 = 0.2 * jax.random.normal(ks[3], (Cout, hidden), jnp.float32)  # torch: (Cout,hidden,1,1)

    def bn_params(k, C):
        k1, k2, k3, k4 = jax.random.split(k, 4)
        gamma = 1.0 + 0.1 * jax.random.normal(k1, (C,), jnp.float32)
        beta = 0.1 * jax.random.normal(k2, (C,), jnp.float32)
        mean = 0.1 * jax.random.normal(k3, (C,), jnp.float32)
        var = 1.0 + 0.1 * jax.random.uniform(k4, (C,), jnp.float32)
        return gamma, beta, mean, var

    bn1 = bn_params(ks[4], hidden)
    bn2 = bn_params(ks[5], hidden)
    bn3 = bn_params(ks[6], Cout)

    # stride=1 (with residual) and stride=2 (reworked strided path, no residual)
    for stride in (1, 2):
        out = mbconv_forward(x, w1, wd, w2, bn1, bn2, bn3,
                             stride=stride, kernel_size=K, padding=padding)
        out = jax.block_until_ready(out)
        ref = reference_nchw(x, w1, wd, w2, bn1, bn2, bn3,
                             stride=stride, kernel_size=K, padding=padding)
        ref = jax.block_until_ready(ref)
        assert out.shape == ref.shape, (out.shape, ref.shape, stride)
        max_err = float(jnp.max(jnp.abs(out - ref)))
        if max_err > 2e-2:
            raise AssertionError(
                f"Pallas kernel mismatch at stride={stride}, max abs err = {max_err}")

    print("KERNEL_OK")
</pallas_src>

<mosaic_0001>
module attributes {stable_mosaic.version = 11 : i64} {
  func.func @mbconv_kernel(%arg0: i32, %arg1: memref<1x16x128xf32, #tpu.memory_space<vmem>>, %arg2: memref<128x1536xf32, #tpu.memory_space<vmem>>, %arg3: memref<9x512xf32, #tpu.memory_space<vmem>>, %arg4: memref<512x128xf32, #tpu.memory_space<vmem>>, %arg5: memref<1x2176xf32, #tpu.memory_space<vmem>>, %arg6: memref<1x16x128xf32, #tpu.memory_space<vmem>>) attributes {dimension_semantics = [#tpu.dimension_semantics<parallel>], iteration_bounds = array<i64: 2>, scalar_prefetch = 0 : i64, scratch_operands = 0 : i64, tpu.core_type = #tpu.core_type<tc>, window_params = [{transform_indices = @transform_0, window_bounds = array<i64: 1, 16, 128>}, {pipeline_mode = #tpu.pipeline_mode<synchronous>, transform_indices = @transform_1, window_bounds = array<i64: 128, 1536>}, {pipeline_mode = #tpu.pipeline_mode<synchronous>, transform_indices = @transform_2, window_bounds = array<i64: 9, 512>}, {pipeline_mode = #tpu.pipeline_mode<synchronous>, transform_indices = @transform_3, window_bounds = array<i64: 512, 128>}, {pipeline_mode = #tpu.pipeline_mode<synchronous>, transform_indices = @transform_4, window_bounds = array<i64: 1, 2176>}, {transform_indices = @transform_5, window_bounds = array<i64: 1, 16, 128>}]} {
    %c0 = arith.constant 0 : index
    %c0_0 = arith.constant 0 : index
    %c0_1 = arith.constant 0 : index
    %0 = vector.load %arg1[%c0, %c0_0, %c0_1] : memref<1x16x128xf32, #tpu.memory_space<vmem>>, vector<1x16x128xf32>
    %1 = vector.shape_cast %0 : vector<1x16x128xf32> to vector<16x128xf32>
    %c0_2 = arith.constant 0 : index
    %c0_3 = arith.constant 0 : index
    %2 = vector.load %arg5[%c0_2, %c0_3] : memref<1x2176xf32, #tpu.memory_space<vmem>>, vector<1x1536xf32>
    %c0_4 = arith.constant 0 : index
    %c0_5 = arith.constant 0 : index
    %3 = vector.load %arg2[%c0_4, %c0_5] : memref<128x1536xf32, #tpu.memory_space<vmem>>, vector<128x1536xf32>
    %cst = arith.constant dense<0.000000e+00> : vector<16x1536xf32>
    %4 = tpu.matmul %1, %3, %cst {dimension_numbers = #tpu.dot_dimension_numbers<[1], [0], [0], [1], [0, 0, 1, 1], [], []>} : vector<16x128xf32>, vector<128x1536xf32>, vector<16x1536xf32> -> vector<16x1536xf32>
    %5 = vector.broadcast %2 : vector<1x1536xf32> to vector<16x1536xf32>
    %6 = arith.addf %4, %5 : vector<16x1536xf32>
    %cst_6 = arith.constant 0.000000e+00 : f32
    %cst_7 = arith.constant 6.000000e+00 : f32
    %7 = vector.broadcast %cst_6 : f32 to vector<16x1536xf32>
    %8 = arith.maximumf %7, %6 : vector<16x1536xf32>
    %9 = vector.broadcast %cst_7 : f32 to vector<16x1536xf32>
    %10 = arith.minimumf %9, %8 : vector<16x1536xf32>
    %cst_8 = arith.constant 0.000000e+00 : f32
    %11 = vector.broadcast %cst_8 : f32 to vector<1x1536xf32>
    %12 = tpu.concatenate %11, %10, %11 in 0 : vector<1x1536xf32>, vector<16x1536xf32>, vector<1x1536xf32> -> vector<18x1536xf32>
    %cst_9 = arith.constant 0.000000e+00 : f32
    %13 = vector.broadcast %cst_9 : f32 to vector<16x512xf32>
    %14 = vector.extract_strided_slice %12 {offsets = [0, 0], sizes = [18, 512], strides = [1, 1]} : vector<18x1536xf32> to vector<18x512xf32>
    %c0_10 = arith.constant 0 : index
    %c0_11 = arith.constant 0 : index
    %15 = vector.load %arg3[%c0_10, %c0_11] : memref<9x512xf32, #tpu.memory_space<vmem>>, vector<1x512xf32>
    %16 = vector.extract_strided_slice %14 {offsets = [0, 0], sizes = [16, 512], strides = [1, 1]} : vector<18x512xf32> to vector<16x512xf32>
    %17 = vector.broadcast %15 : vector<1x512xf32> to vector<16x512xf32>
    %18 = arith.mulf %16, %17 : vector<16x512xf32>
    %19 = arith.addf %13, %18 : vector<16x512xf32>
    %c3 = arith.constant 3 : index
    %c0_12 = arith.constant 0 : index
    %20 = vector.load %arg3[%c3, %c0_12] : memref<9x512xf32, #tpu.memory_space<vmem>>, vector<1x512xf32>
    %21 = vector.extract_strided_slice %14 {offsets = [1, 0], sizes = [16, 512], strides = [1, 1]} : vector<18x512xf32> to vector<16x512xf32>
    %22 = vector.broadcast %20 : vector<1x512xf32> to vector<16x512xf32>
    %23 = arith.mulf %21, %22 : vector<16x512xf32>
    %24 = arith.addf %19, %23 : vector<16x512xf32>
    %c6 = arith.constant 6 : index
    %c0_13 = arith.constant 0 : index
    %25 = vector.load %arg3[%c6, %c0_13] : memref<9x512xf32, #tpu.memory_space<vmem>>, vector<1x512xf32>
    %26 = vector.extract_strided_slice %14 {offsets = [2, 0], sizes = [16, 512], strides = [1, 1]} : vector<18x512xf32> to vector<16x512xf32>
    %27 = vector.broadcast %25 : vector<1x512xf32> to vector<16x512xf32>
    %28 = arith.mulf %26, %27 : vector<16x512xf32>
    %29 = arith.addf %24, %28 : vector<16x512xf32>
    %30 = vector.extract_strided_slice %12 {offsets = [0, 512], sizes = [18, 512], strides = [1, 1]} : vector<18x1536xf32> to vector<18x512xf32>
    %c1 = arith.constant 1 : index
    %c0_14 = arith.constant 0 : index
    %31 = vector.load %arg3[%c1, %c0_14] : memref<9x512xf32, #tpu.memory_space<vmem>>, vector<1x512xf32>
    %32 = vector.extract_strided_slice %30 {offsets = [0, 0], sizes = [16, 512], strides = [1, 1]} : vector<18x512xf32> to vector<16x512xf32>
    %33 = vector.broadcast %31 : vector<1x512xf32> to vector<16x512xf32>
    %34 = arith.mulf %32, %33 : vector<16x512xf32>
    %35 = arith.addf %29, %34 : vector<16x512xf32>
    %c4 = arith.constant 4 : index
    %c0_15 = arith.constant 0 : index
    %36 = vector.load %arg3[%c4, %c0_15] : memref<9x512xf32, #tpu.memory_space<vmem>>, vector<1x512xf32>
    %37 = vector.extract_strided_slice %30 {offsets = [1, 0], sizes = [16, 512], strides = [1, 1]} : vector<18x512xf32> to vector<16x512xf32>
    %38 = vector.broadcast %36 : vector<1x512xf32> to vector<16x512xf32>
    %39 = arith.mulf %37, %38 : vector<16x512xf32>
    %40 = arith.addf %35, %39 : vector<16x512xf32>
    %c7 = arith.constant 7 : index
    %c0_16 = arith.constant 0 : index
    %41 = vector.load %arg3[%c7, %c0_16] : memref<9x512xf32, #tpu.memory_space<vmem>>, vector<1x512xf32>
    %42 = vector.extract_strided_slice %30 {offsets = [2, 0], sizes = [16, 512], strides = [1, 1]} : vector<18x512xf32> to vector<16x512xf32>
    %43 = vector.broadcast %41 : vector<1x512xf32> to vector<16x512xf32>
    %44 = arith.mulf %42, %43 : vector<16x512xf32>
    %45 = arith.addf %40, %44 : vector<16x512xf32>
    %46 = vector.extract_strided_slice %12 {offsets = [0, 1024], sizes = [18, 512], strides = [1, 1]} : vector<18x1536xf32> to vector<18x512xf32>
    %c2 = arith.constant 2 : index
    %c0_17 = arith.constant 0 : index
    %47 = vector.load %arg3[%c2, %c0_17] : memref<9x512xf32, #tpu.memory_space<vmem>>, vector<1x512xf32>
    %48 = vector.extract_strided_slice %46 {offsets = [0, 0], sizes = [16, 512], strides = [1, 1]} : vector<18x512xf32> to vector<16x512xf32>
    %49 = vector.broadcast %47 : vector<1x512xf32> to vector<16x512xf32>
    %50 = arith.mulf %48, %49 : vector<16x512xf32>
    %51 = arith.addf %45, %50 : vector<16x512xf32>
    %c5 = arith.constant 5 : index
    %c0_18 = arith.constant 0 : index
    %52 = vector.load %arg3[%c5, %c0_18] : memref<9x512xf32, #tpu.memory_space<vmem>>, vector<1x512xf32>
    %53 = vector.extract_strided_slice %46 {offsets = [1, 0], sizes = [16, 512], strides = [1, 1]} : vector<18x512xf32> to vector<16x512xf32>
    %54 = vector.broadcast %52 : vector<1x512xf32> to vector<16x512xf32>
    %55 = arith.mulf %53, %54 : vector<16x512xf32>
    %56 = arith.addf %51, %55 : vector<16x512xf32>
    %c8 = arith.constant 8 : index
    %c0_19 = arith.constant 0 : index
    %57 = vector.load %arg3[%c8, %c0_19] : memref<9x512xf32, #tpu.memory_space<vmem>>, vector<1x512xf32>
    %58 = vector.extract_strided_slice %46 {offsets = [2, 0], sizes = [16, 512], strides = [1, 1]} : vector<18x512xf32> to vector<16x512xf32>
    %59 = vector.broadcast %57 : vector<1x512xf32> to vector<16x512xf32>
    %60 = arith.mulf %58, %59 : vector<16x512xf32>
    %61 = arith.addf %56, %60 : vector<16x512xf32>
    %c0_20 = arith.constant 0 : index
    %c1536 = arith.constant 1536 : index
    %62 = vector.load %arg5[%c0_20, %c1536] : memref<1x2176xf32, #tpu.memory_space<vmem>>, vector<1x512xf32>
    %63 = vector.broadcast %62 : vector<1x512xf32> to vector<16x512xf32>
    %64 = arith.addf %61, %63 : vector<16x512xf32>
    %cst_21 = arith.constant 0.000000e+00 : f32
    %cst_22 = arith.constant 6.000000e+00 : f32
    %65 = vector.broadcast %cst_21 : f32 to vector<16x512xf32>
    %66 = arith.maximumf %65, %64 : vector<16x512xf32>
    %67 = vector.broadcast %cst_22 : f32 to vector<16x512xf32>
    %68 = arith.minimumf %67, %66 : vector<16x512xf32>
    %c0_23 = arith.constant 0 : index
    %c2048 = arith.constant 2048 : index
    %69 = vector.load %arg5[%c0_23, %c2048] : memref<1x2176xf32, #tpu.memory_space<vmem>>, vector<1x128xf32>
    %c0_24 = arith.constant 0 : index
    %c0_25 = arith.constant 0 : index
    %70 = vector.load %arg4[%c0_24, %c0_25] : memref<512x128xf32, #tpu.memory_space<vmem>>, vector<512x128xf32>
    %cst_26 = arith.constant dense<0.000000e+00> : vector<16x128xf32>
    %71 = tpu.matmul %68, %70, %cst_26 {dimension_numbers = #tpu.dot_dimension_numbers<[1], [0], [0], [1], [0, 0, 1, 1], [], []>} : vector<16x512xf32>, vector<512x128xf32>, vector<16x128xf32> -> vector<16x128xf32>
    %72 = vector.broadcast %69 : vector<1x128xf32> to vector<16x128xf32>
    %73 = arith.addf %71, %72 : vector<16x128xf32>
    %74 = arith.addf %73, %1 : vector<16x128xf32>
    %c0_27 = arith.constant 0 : index
    %c0_28 = arith.constant 0 : index
    %c0_29 = arith.constant 0 : index
    %75 = vector.load %arg6[%c0_27, %c0_28, %c0_29] : memref<1x16x128xf32, #tpu.memory_space<vmem>>, vector<1x16x128xf32>
    %76 = vector.shape_cast %75 : vector<1x16x128xf32> to vector<16x128xf32>
    %77 = vector.shape_cast %74 : vector<16x128xf32> to vector<1x16x128xf32>
    tpu.vector_store %arg6[%c0_27, %c0_28, %c0_29], %77 {strides = array<i32>} : memref<1x16x128xf32, #tpu.memory_space<vmem>>, vector<1x16x128xf32>,
    return
  }
  func.func @transform_0(%arg0: i32) -> (i32, i32, i32) {
    %c0_i32 = arith.constant 0 : i32
    %c0_i32_0 = arith.constant 0 : i32
    %c0_i32_1 = arith.constant 0 : i32
    return %arg0, %c0_i32, %c0_i32_0 : i32, i32, i32
  }
  func.func @transform_1(%arg0: i32) -> (i32, i32) {
    %c0_i32 = arith.constant 0 : i32
    %c0_i32_0 = arith.constant 0 : i32
    %c0_i32_1 = arith.constant 0 : i32
    return %c0_i32, %c0_i32_0 : i32, i32
  }
  func.func @transform_2(%arg0: i32) -> (i32, i32) {
    %c0_i32 = arith.constant 0 : i32
    %c0_i32_0 = arith.constant 0 : i32
    %c0_i32_1 = arith.constant 0 : i32
    return %c0_i32, %c0_i32_0 : i32, i32
  }
  func.func @transform_3(%arg0: i32) -> (i32, i32) {
    %c0_i32 = arith.constant 0 : i32
    %c0_i32_0 = arith.constant 0 : i32
    %c0_i32_1 = arith.constant 0 : i32
    return %c0_i32, %c0_i32_0 : i32, i32
  }
  func.func @transform_4(%arg0: i32) -> (i32, i32) {
    %c0_i32 = arith.constant 0 : i32
    %c0_i32_0 = arith.constant 0 : i32
    %c0_i32_1 = arith.constant 0 : i32
    return %c0_i32, %c0_i32_0 : i32, i32
  }
  func.func @transform_5(%arg0: i32) -> (i32, i32, i32) {
    %c0_i32 = arith.constant 0 : i32
    %c0_i32_0 = arith.constant 0 : i32
    %c0_i32_1 = arith.constant 0 : i32
    return %arg0, %c0_i32, %c0_i32_0 : i32, i32, i32
  }
}

</mosaic_0001>

<bundles_post_ra>
// kernel: tpu_custom_call.1
= control target key start
LH: loop header
LB: loop body
LE: loop exit
PB: predicated region body
PF: predicated region fallthrough
CT: control target
= control target key end

     0   :  { %10 = vsyncpa [#allocation3], 0  ;;  %s3145_s0 = inlined_call_operand.hbm [shape: f32[2,16,128], index: 0, kind: input, shape index: {}]   ;;  %s3146_s1 = inlined_call_operand.hbm [shape: f32[128,1536], index: 1, kind: input, shape index: {}]   ;;  %s3147_s2 = inlined_call_operand.hbm [shape: f32[9,512], index: 2, kind: input, shape index: {}]   ;;  %s3148_s3 = inlined_call_operand.hbm [shape: f32[512,128], index: 3, kind: input, shape index: {}]   ;;  %s3149_s4 = inlined_call_operand.hbm [shape: f32[1,2176], index: 4, kind: input, shape index: {}]   ;;  %s3150_s5 = inlined_call_operand.hbm [shape: f32[2,16,128], index: 5, kind: output, shape index: {}]  }
   0x1   :  { %12 = vsyncpa [#allocation3 + $0x1], 0 }
   0x2   :  { %13 = vsyncpa [#allocation6], 0 }
   0x3   :  { %14 = vsyncpa [#allocation9], 0 }
   0x4   :  { %15 = vsyncpa [#allocation4], 0 }
   0x5   :  { %17 = vsyncpa [#allocation4 + $0x1], 0  ;;  %s2199_s18 = smov 0   ;;  %s2201_s19 = smov 0  }
   0x6   :  { %s2203_s20 = smov 0   ;;  %s2205_s21 = smov 0  }
   0x7 LB: > { %s2220_s22 = sadd.s32 4294967295, %s2155_s21   ;;  %s1809_s23 = sadd.s32 4294967294, %s2155_s21   ;;  %s2155_s21 = sphi %s2205_s21, %s3182_s21   ;;  %s2151_s20 = sphi %s2203_s20, %s3181_s20   ;;  %s2147_s19 = sphi %s2201_s19, %s3180_s19   ;;  %s2143_s18 = sphi %s2199_s18, %s3179_s18  }
   0x8   : > { %p43_p0 = scmp.ne.s32.totalorder %s2147_s19, %s2143_s18  ;;  %p44_p1 = scmp.eq.s32.totalorder %s2220_s22, 0 }
   0x9   : > { %p151_p2 = scmp.eq.s32.totalorder %s2220_s22, 1  ;;  %p157_p3 = scmp.eq.s32.totalorder %s1809_s23, 1 }
   0xa   : > { %p2229_p4 = por %p44_p1, %p43_p0  ;;  %p1810_p5 = scmp.ge.s32.totalorder %s2155_s21, 1 }
   0xb   : > { %p2234_p6 = por %p157_p3, %p43_p0  ;;  %p164_p7 = scmp.lt.s32.totalorder %s2155_s21, 3 }
   0xc   : > { %s175_s28 = sshll.u32 %s3146_s1, 4  ;;  %s2157_s30 = smov [#allocation5]   ;;  %s176_s28 = int_to_ptr.hbm [resolvable:$true] %s175_s28 }
   0xd   : > { %p2242_p8 = pnand %p1810_p5, %p164_p7  ;;  %s177_s6 = sshll.u32 %s2157_s30, 4  ;;  %s178_s6 = int_to_ptr.vmem [resolvable:$true] %s177_s6 }
   0xe   : > { %s203_s10 = sshll.u32 %s3148_s3, 4  ;;  %s2158_s11 = smov 1536   ;;  %s204_s10 = int_to_ptr.hbm [resolvable:$true] %s203_s10 }
   0xf   : > { %p1853_p9 = pneg %p2242_p8  ;;  %s2159_s12 = smov 96  }
  0x10   : > { %s2160_s13 = smov [#allocation8]   ;;  %s3151_s15 = smov 128  }
  0x11   : > { %p2250_p10 = pnand %p1853_p9, %p44_p1  ;;  %s205_s14 = sshll.u32 %s2160_s13, 4  ;;  %s206_s14 = int_to_ptr.vmem [resolvable:$true] %s205_s14 }
  0x12   : > { %s2162_s16 = smov 8   ;;  %s189_s26 = sshll.u32 %s3147_s2, 4  ;;  %s190_s26 = int_to_ptr.hbm [resolvable:$true] %s189_s26 }
  0x13   : > { %1856 = dma.hbm_to_vmem [thread:$0]  (!%p2250_p10), %s176_s28, 24576, %s178_s6, [#allocation6], %s2158_s11, %s2158_s11, %s2159_s12  }
  0x14   : > { %1862 = dma.hbm_to_vmem [thread:$0]  (!%p2250_p10), %s204_s10, 8192, %s206_s14, [#allocation9], %s3151_s15, %s3151_s15, %s2162_s16  }
  0x15   : > { %s2163_s27 = smov [#allocation7]   ;;  %s218_s8 = sshll.u32 %s3149_s4, 4  ;;  %s219_s8 = int_to_ptr.hbm [resolvable:$true] %s218_s8 }
  0x16   : > { %s191_s28 = sshll.u32 %s2163_s27, 4  ;;  %s2164_s9 = smov 512   ;;  %s192_s28 = int_to_ptr.vmem [resolvable:$true] %s191_s28 }
  0x17   : > { %s2165_s10 = smov 32   ;;  %s2166_s11 = smov [#allocation10]  }
  0x18   : > { %1859 = dma.hbm_to_vmem [thread:$0]  (!%p2250_p10), %s190_s26, 1024, %s192_s28, [#allocation6], %s2164_s9, %s2164_s9, %s2165_s10  }
  0x19   : > { %s220_s12 = sshll.u32 %s2166_s11, 4  ;;  %s2276_s13 = sadd.s32 1, %s2155_s21   ;;  %s221_s12 = int_to_ptr.vmem [resolvable:$true] %s220_s12 }
  0x1a   : > { %1865 = dma.hbm_to_vmem [thread:$0]  (!%p2250_p10), %s219_s8, 272, %s221_s12, [#allocation9]  }
  0x1b   : > { %s30_s14 = sadd.s32 1, %s2151_s20  ;;  %s27_s17 = ssub.s32 %s2155_s21, %s2276_s13 }
  0x1c   : > { %p37_p12 = scmp.ne.s32.totalorder %s2151_s20, %s2147_s19  ;;  %p28_p13 = scmp.eq.s32.totalorder %s27_s17, 0 }
  0x1d   : > { %p38_p0 = scmp.eq.s32.totalorder %s2155_s21, 0  ;;  %p1878_p5 = scmp.lt.s32.totalorder %s2155_s21, 2 }
  0x1e   : > { %p2286_p3 = por %p151_p2, %p37_p12  ;;  %s231_s27 = sand.u32 1, %s2151_s20  }
  0x1f   : > { %s2292_s26 = scalar_select %p28_p13, %s2151_s20, %s30_s14  }
  0x20   : > { %p39_p7 = por %p38_p0, %p37_p12  ;;  %s1816_s7 = sshll.u32 %s231_s27, 4 }
  0x21   : > { %s1831_s28 = sshll.u32 %s2155_s21, 4  ;;  %s235_s9 = scalar_lea.vmem [#allocation2], %s1816_s7 }
  0x22   : > { %s240_s8 = scalar_lea.hbm %s3145_s0, %s1831_s28  ;;  %s243_s10 = sshll.u32 %s235_s9, 4  ;;  %s244_s10 = int_to_ptr.vmem [resolvable:$true] %s243_s10 }
  0x23   : > { %s241_s11 = sshll.u32 %s240_s8, 4  ;;  %p2299_p2 = pnand %p1878_p5, %p39_p7  ;;  %s242_s11 = int_to_ptr.hbm [resolvable:$true] %s241_s11 }
  0x24   : > { %s232_s14 = scalar_lea.sflag [#allocation3], %s231_s27  ;;  %s2051_s17 = sshra.s32 %s242_s11, 4  ;;  %s2052_s17 = int_to_ptr.hbm [resolvable:$true] %s2051_s17 }
  0x25   : > { %s2053_s15 = scalar_lea.hbm %s2052_s17, 16  ;;  %p2055_p10 = pneg %p2299_p2 }
  0x26   : > { %p2054_p9 = scmp.ne.s32.totalorder %s2052_s17, %s2053_s15  ;;  %s2058_s30 = scalar_lea.hbm %s3145_s0, 32 }
  0x27   : > { %p2059_p0 = scmp.lt.s32.totalorder %s2052_s17, %s3145_s0  ;;  %p2060_p5 = scmp.lt.s32.totalorder %s2058_s30, %s2053_s15 }
  0x28   : > { %p2056_p12 = pnand %p2055_p10, %p2054_p9 }
  0x29   : > { %p2061_p7 = por %p2060_p5, %p2059_p0 }
  0x2a   : > { %p2057_p13 = pneg %p2056_p12 }
  0x2c   : > { %p2062_p11 = pnand %p2061_p7, %p2057_p13 }
  0x2e   : > { %2065 = shalt.err (!%p2062_p11)
}
  0x2f   : > { %s3160_s27 = smov 128   ;;  %255 = sbr.rel (%p2242_p8) target bundleno = 508 (0x1fc), region = 40 }
  0x30   : > { %1869 = dma.hbm_to_vmem [thread:$0]  (!%p2299_p2), %s242_s11, 256, %s244_s10, %s232_s14, %s3160_s27, %s3160_s27, %s2162_s16  }
  0x31   : > { %s2319_s9 = sand.u32 (!%p2242_p8), 1, %s2147_s19  }
  0x32   : > { %s1820_s15 = sshll.u32 (!%p2242_p8), %s2319_s9, 4  ;;  %s258_s17 = scalar_lea.sflag (!%p2242_p8), [#allocation3], %s2319_s9 }
  0x33   : > { %s2325_s28 = scalar_lea.vmem (!%p2242_p8), [#allocation2], %s1820_s15 }
  0x34   : > { %2126 = dma.done.wait (%p2229_p4), %s258_s17, 256  }
  0x35   : > { %2128 = vsyncadd (%p2229_p4), %s258_s17, 4294967040 }
  0x36   : > { %2130 = dma.done.wait (%p44_p1), [#allocation6], 25600  }
  0x37   : > { %2132 = vsyncadd (%p44_p1), [#allocation6], 4294941696 }
  0x38   : > { %2134 = dma.done.wait (%p44_p1), [#allocation9], 8464  }
  0x39   : > { %2136 = vsyncadd (%p44_p1), [#allocation9], 4294958832  ;;  %v493_v0 = vld [vmem:[#allocation5 + $0x5a0] sm:$0xff]  ;;  %v494_v1 = vld [vmem:[#allocation5 + $0x5a8] sm:$0xff]  ;;  %vm879_vm0 = vcmask 1040384   ;;  %vm1037_vm1 = vcmask 1046528  }
  0x3a   : > { %v495_v2 = vld [vmem:[#allocation5 + $0x5b0] sm:$0xff]  ;;  %531 = vmatpush.msra.mxu0 %v493_v0  ;;  %554 = vmatpush.msra.mxu1 %v494_v1  ;;  %v496_v3 = vld [vmem:[#allocation5 + $0x5b8] sm:$0xff]  ;;  %v481_v4 = vld [vmem:[#allocation5 + $0x540] sm:$0xff]  ;;  %vm1109_vm2 = vcmask 1045504   ;;  %s1832_s24 = sshll.u32 %s2220_s22, 4  ;;  %s308_s29 = scalar_lea.vmem [#allocation11], %s1820_s15 }
  0x3b   : > { %v482_v5 = vld [vmem:[#allocation5 + $0x548] sm:$0xff]  ;;  %577 = vmatpush.msra.mxu2 %v495_v2  ;;  %600 = vmatpush.msra.mxu3 %v496_v3  ;;  %v483_v6 = vld [vmem:[#allocation5 + $0x550] sm:$0xff]  ;;  %v484_v7 = vld [vmem:[#allocation5 + $0x558] sm:$0xff]  ;;  %s1694_s11 = scalar_lea.hbm %s3150_s5, %s1832_s24  ;;  %s1695_s12 = sshll.u32 %s308_s29, 4  ;;  %s1696_s12 = int_to_ptr.vmem [resolvable:$true] %s1695_s12 }
  0x3c   : > { %v469_v8 = vld [vmem:[#allocation5 + $0x4e0] sm:$0xff]  ;;  %532 = vmatpush.msra.mxu0 %v481_v4  ;;  %555 = vmatpush.msra.mxu1 %v482_v5  ;;  %v470_v9 = vld [vmem:[#allocation5 + $0x4e8] sm:$0xff]  ;;  %v471_v10 = vld [vmem:[#allocation5 + $0x4f0] sm:$0xff]  ;;  %s1697_s14 = sshll.u32 %s1694_s11, 4  ;;  %s1683_s22 = scalar_lea.sflag [#allocation4], %s2319_s9  ;;  %s1698_s14 = int_to_ptr.hbm [resolvable:$true] %s1697_s14 }
  0x3d   : > { %v472_v11 = vld [vmem:[#allocation5 + $0x4f8] sm:$0xff]  ;;  %578 = vmatpush.msra.mxu2 %v483_v6  ;;  %601 = vmatpush.msra.mxu3 %v484_v7  ;;  %v457_v12 = vld [vmem:[#allocation5 + $0x480] sm:$0xff]  ;;  %v458_v13 = vld [vmem:[#allocation5 + $0x488] sm:$0xff]  ;;  %s2095_s7 = sshra.s32 %s1698_s14, 4  ;;  %s2101_s27 = scalar_lea.hbm %s3150_s5, 32  ;;  %s2096_s7 = int_to_ptr.hbm [resolvable:$true] %s2095_s7 }
  0x3e   : > { %533 = vmatpush.msra.mxu0 %v469_v8  ;;  %556 = vmatpush.msra.mxu1 %v470_v9  ;;  %v459_v14 = vld [vmem:[#allocation5 + $0x490] sm:$0xff]  ;;  %v460_v15 = vld [vmem:[#allocation5 + $0x498] sm:$0xff]  ;;  %v445_v16 = vld [vmem:[#allocation5 + $0x420] sm:$0xff]  ;;  %s2097_s30 = scalar_lea.hbm %s2096_s7, 16  ;;  %p2102_p11 = scmp.lt.s32.totalorder %s2096_s7, %s3150_s5 }
  0x3f   : > { %579 = vmatpush.msra.mxu2 %v471_v10  ;;  %602 = vmatpush.msra.mxu3 %v472_v11  ;;  %v446_v17 = vld [vmem:[#allocation5 + $0x428] sm:$0xff]  ;;  %v447_v18 = vld [vmem:[#allocation5 + $0x430] sm:$0xff]  ;;  %v448_v19 = vld [vmem:[#allocation5 + $0x438] sm:$0xff]  ;;  %p2098_p1 = scmp.ne.s32.totalorder %s2096_s7, %s2097_s30  ;;  %p2103_p2 = scmp.lt.s32.totalorder %s2101_s27, %s2097_s30 }
  0x40   : > { %534 = vmatpush.msra.mxu0 %v457_v12  ;;  %557 = vmatpush.msra.mxu1 %v458_v13  ;;  %v433_v20 = vld [vmem:[#allocation5 + $0x3c0] sm:$0xff]  ;;  %v434_v21 = vld [vmem:[#allocation5 + $0x3c8] sm:$0xff]  ;;  %v435_v22 = vld [vmem:[#allocation5 + $0x3d0] sm:$0xff] }
  0x41   : > { %580 = vmatpush.msra.mxu2 %v459_v14  ;;  %603 = vmatpush.msra.mxu3 %v460_v15  ;;  %v436_v23 = vld [vmem:[#allocation5 + $0x3d8] sm:$0xff]  ;;  %v421_v24 = vld [vmem:[#allocation5 + $0x360] sm:$0xff]  ;;  %v422_v25 = vld [vmem:[#allocation5 + $0x368] sm:$0xff]  ;;  %p2099_p4 = pnand %p2098_p1, %p2286_p3  ;;  %p2104_p9 = por %p2103_p2, %p2102_p11 }
  0x42   : > { %535 = vmatpush.msra.mxu0 %v445_v16  ;;  %558 = vmatpush.msra.mxu1 %v446_v17  ;;  %v423_v26 = vld [vmem:[#allocation5 + $0x370] sm:$0xff]  ;;  %v424_v27 = vld [vmem:[#allocation5 + $0x378] sm:$0xff]  ;;  %v409_v28 = vld [vmem:[#allocation5 + $0x300] sm:$0xff] }
  0x43   : > { %581 = vmatpush.msra.mxu2 %v447_v18  ;;  %604 = vmatpush.msra.mxu3 %v448_v19  ;;  %v410_v29 = vld [vmem:[#allocation5 + $0x308] sm:$0xff]  ;;  %v411_v30 = vld [vmem:[#allocation5 + $0x310] sm:$0xff]  ;;  %v412_v31 = vld [vmem:[#allocation5 + $0x318] sm:$0xff]  ;;  %p2100_p8 = pneg %p2099_p4 }
  0x44   : > { %536 = vmatpush.msra.mxu0 %v433_v20  ;;  %559 = vmatpush.msra.mxu1 %v434_v21  ;;  %v397_v32 = vld [vmem:[#allocation5 + $0x2a0] sm:$0xff]  ;;  %v398_v33 = vld [vmem:[#allocation5 + $0x2a8] sm:$0xff]  ;;  %v399_v34 = vld [vmem:[#allocation5 + $0x2b0] sm:$0xff] }
  0x45   : > { %582 = vmatpush.msra.mxu2 %v435_v22  ;;  %605 = vmatpush.msra.mxu3 %v436_v23  ;;  %v400_v35 = vld [vmem:[#allocation5 + $0x2b8] sm:$0xff]  ;;  %v385_v36 = vld [vmem:[#allocation5 + $0x240] sm:$0xff]  ;;  %v386_v37 = vld [vmem:[#allocation5 + $0x248] sm:$0xff]  ;;  %p2105_p10 = pnand %p2104_p9, %p2100_p8 }
  0x46   : > { %537 = vmatpush.msra.mxu0 %v421_v24  ;;  %560 = vmatpush.msra.mxu1 %v422_v25  ;;  %v387_v38 = vld [vmem:[#allocation5 + $0x250] sm:$0xff]  ;;  %v388_v39 = vld [vmem:[#allocation5 + $0x258] sm:$0xff]  ;;  %v373_v40 = vld [vmem:[#allocation5 + $0x1e0] sm:$0xff] }
  0x47   : > { %583 = vmatpush.msra.mxu2 %v423_v26  ;;  %606 = vmatpush.msra.mxu3 %v424_v27  ;;  %v374_v41 = vld [vmem:[#allocation5 + $0x1e8] sm:$0xff]  ;;  %v375_v42 = vld [vmem:[#allocation5 + $0x1f0] sm:$0xff]  ;;  %v376_v43 = vld [vmem:[#allocation5 + $0x1f8] sm:$0xff] }
  0x48   : > { %538 = vmatpush.msra.mxu0 %v409_v28  ;;  %561 = vmatpush.msra.mxu1 %v410_v29  ;;  %v361_v44 = vld [vmem:[#allocation5 + $0x180] sm:$0xff]  ;;  %v362_v45 = vld [vmem:[#allocation5 + $0x188] sm:$0xff]  ;;  %v363_v46 = vld [vmem:[#allocation5 + $0x190] sm:$0xff] }
  0x49   : > { %584 = vmatpush.msra.mxu2 %v411_v30  ;;  %607 = vmatpush.msra.mxu3 %v412_v31  ;;  %v364_v47 = vld [vmem:[#allocation5 + $0x198] sm:$0xff]  ;;  %v349_v48 = vld [vmem:[#allocation5 + $0x120] sm:$0xff]  ;;  %v350_v49 = vld [vmem:[#allocation5 + $0x128] sm:$0xff] }
  0x4a   : > { %539 = vmatpush.msra.mxu0 %v397_v32  ;;  %562 = vmatpush.msra.mxu1 %v398_v33  ;;  %v351_v50 = vld [vmem:[#allocation5 + $0x130] sm:$0xff]  ;;  %v352_v51 = vld [vmem:[#allocation5 + $0x138] sm:$0xff]  ;;  %v337_v52 = vld [vmem:[#allocation5 + $0xc0] sm:$0xff] }
  0x4b   : > { %585 = vmatpush.msra.mxu2 %v399_v34  ;;  %608 = vmatpush.msra.mxu3 %v400_v35  ;;  %v338_v53 = vld [vmem:[#allocation5 + $0xc8] sm:$0xff]  ;;  %v339_v54 = vld [vmem:[#allocation5 + $0xd0] sm:$0xff]  ;;  %v340_v55 = vld [vmem:[#allocation5 + $0xd8] sm:$0xff] }
  0x4c   : > { %540 = vmatpush.msra.mxu0 %v385_v36  ;;  %563 = vmatpush.msra.mxu1 %v386_v37  ;;  %v325_v56 = vld [vmem:[#allocation5 + $0x60] sm:$0xff]  ;;  %v326_v57 = vld [vmem:[#allocation5 + $0x68] sm:$0xff]  ;;  %v327_v58 = vld [vmem:[#allocation5 + $0x70] sm:$0xff] }
  0x4d   : > { %586 = vmatpush.msra.mxu2 %v387_v38  ;;  %609 = vmatpush.msra.mxu3 %v388_v39  ;;  %v328_v59 = vld [vmem:[#allocation5 + $0x78] sm:$0xff]  ;;  %v313_v60 = vld [vmem:[#allocation5] sm:$0xff]  ;;  %v314_v61 = vld [vmem:[#allocation5 + $0x8] sm:$0xff] }
  0x4e   : > { %541 = vmatpush.msra.mxu0 %v373_v40  ;;  %564 = vmatpush.msra.mxu1 %v374_v41  ;;  %v315_v62 = vld [vmem:[#allocation5 + $0x10] sm:$0xff]  ;;  %v316_v63 = vld [vmem:[#allocation5 + $0x18] sm:$0xff]  ;;  %v497_v0 = vld [vmem:[#allocation5 + $0x5c0] sm:$0xff] }
  0x4f   : > { %587 = vmatpush.msra.mxu2 %v375_v42  ;;  %610 = vmatpush.msra.mxu3 %v376_v43  ;;  %v498_v1 = vld [vmem:[#allocation5 + $0x5c8] sm:$0xff]  ;;  %v499_v2 = vld [vmem:[#allocation5 + $0x5d0] sm:$0xff]  ;;  %v500_v3 = vld [vmem:[#allocation5 + $0x5d8] sm:$0xff] }
  0x50   : > { %542 = vmatpush.msra.mxu0 %v361_v44  ;;  %565 = vmatpush.msra.mxu1 %v362_v45  ;;  %v485_v4 = vld [vmem:[#allocation5 + $0x560] sm:$0xff]  ;;  %v486_v5 = vld [vmem:[#allocation5 + $0x568] sm:$0xff]  ;;  %v487_v6 = vld [vmem:[#allocation5 + $0x570] sm:$0xff] }
  0x51   : > { %588 = vmatpush.msra.mxu2 %v363_v46  ;;  %611 = vmatpush.msra.mxu3 %v364_v47  ;;  %v488_v7 = vld [vmem:[#allocation5 + $0x578] sm:$0xff]  ;;  %v473_v8 = vld [vmem:[#allocation5 + $0x500] sm:$0xff]  ;;  %v474_v9 = vld [vmem:[#allocation5 + $0x508] sm:$0xff] }
  0x52   : > { %543 = vmatpush.msra.mxu0 %v349_v48  ;;  %566 = vmatpush.msra.mxu1 %v350_v49  ;;  %v475_v10 = vld [vmem:[#allocation5 + $0x510] sm:$0xff]  ;;  %v476_v11 = vld [vmem:[#allocation5 + $0x518] sm:$0xff]  ;;  %v461_v12 = vld [vmem:[#allocation5 + $0x4a0] sm:$0xff] }
  0x53   : > { %589 = vmatpush.msra.mxu2 %v351_v50  ;;  %612 = vmatpush.msra.mxu3 %v352_v51  ;;  %v462_v13 = vld [vmem:[#allocation5 + $0x4a8] sm:$0xff]  ;;  %v463_v14 = vld [vmem:[#allocation5 + $0x4b0] sm:$0xff]  ;;  %v464_v15 = vld [vmem:[#allocation5 + $0x4b8] sm:$0xff] }
  0x54   : > { %544 = vmatpush.msra.mxu0 %v337_v52  ;;  %567 = vmatpush.msra.mxu1 %v338_v53  ;;  %v449_v16 = vld [vmem:[#allocation5 + $0x440] sm:$0xff]  ;;  %v450_v17 = vld [vmem:[#allocation5 + $0x448] sm:$0xff]  ;;  %v451_v18 = vld [vmem:[#allocation5 + $0x450] sm:$0xff] }
  0x55   : > { %590 = vmatpush.msra.mxu2 %v339_v54  ;;  %613 = vmatpush.msra.mxu3 %v340_v55  ;;  %v452_v19 = vld [vmem:[#allocation5 + $0x458] sm:$0xff]  ;;  %v437_v20 = vld [vmem:[#allocation5 + $0x3e0] sm:$0xff]  ;;  %v438_v21 = vld [vmem:[#allocation5 + $0x3e8] sm:$0xff] }
  0x56   : > { %545 = vmatpush.msra.mxu0 %v325_v56  ;;  %568 = vmatpush.msra.mxu1 %v326_v57  ;;  %v439_v22 = vld [vmem:[#allocation5 + $0x3f0] sm:$0xff]  ;;  %v440_v23 = vld [vmem:[#allocation5 + $0x3f8] sm:$0xff]  ;;  %v425_v24 = vld [vmem:[#allocation5 + $0x380] sm:$0xff] }
  0x57   : > { %591 = vmatpush.msra.mxu2 %v327_v58  ;;  %614 = vmatpush.msra.mxu3 %v328_v59  ;;  %v426_v25 = vld [vmem:[#allocation5 + $0x388] sm:$0xff]  ;;  %v427_v26 = vld [vmem:[#allocation5 + $0x390] sm:$0xff]  ;;  %v428_v27 = vld [vmem:[#allocation5 + $0x398] sm:$0xff] }
  0x58   : > { %546 = vmatpush.msra.mxu0 %v313_v60  ;;  %569 = vmatpush.msra.mxu1 %v314_v61  ;;  %v413_v28 = vld [vmem:[#allocation5 + $0x320] sm:$0xff]  ;;  %v414_v29 = vld [vmem:[#allocation5 + $0x328] sm:$0xff]  ;;  %v415_v30 = vld [vmem:[#allocation5 + $0x330] sm:$0xff] }
  0x59   : > { %592 = vmatpush.msra.mxu2 %v315_v62  ;;  %615 = vmatpush.msra.mxu3 %v316_v63  ;;  %v416_v31 = vld [vmem:[#allocation5 + $0x338] sm:$0xff]  ;;  %v2340_v32 = vld [vmem:[%s2325_s28] sm:$0xff]  ;;  %v402_v34 = vld [vmem:[#allocation5 + $0x2c8] sm:$0xff] }
  0x5a   : > { %623 = vmatpush.msrb.mxu0 %v497_v0  ;;  %646 = vmatpush.msrb.mxu1 %v498_v1  ;;  %v401_v33 = vld [vmem:[#allocation5 + $0x2c0] sm:$0xff]  ;;  %v403_v35 = vld [vmem:[#allocation5 + $0x2d0] sm:$0xff]  ;;  %v404_v36 = vld [vmem:[#allocation5 + $0x2d8] sm:$0xff] }
  0x5b   : > { %669 = vmatpush.msrb.mxu2 %v499_v2  ;;  %692 = vmatpush.msrb.mxu3 %v500_v3  ;;  %v390_v37 = vld [vmem:[#allocation5 + $0x268] sm:$0xff]  ;;  %v389_v38 = vld [vmem:[#allocation5 + $0x260] sm:$0xff]  ;;  %v391_v39 = vld [vmem:[#allocation5 + $0x270] sm:$0xff] }
  0x5c   : > { %624 = vmatpush.msrb.mxu0 %v485_v4  ;;  %647 = vmatpush.msrb.mxu1 %v486_v5  ;;  %v392_v40 = vld [vmem:[#allocation5 + $0x278] sm:$0xff]  ;;  %v377_v41 = vld [vmem:[#allocation5 + $0x200] sm:$0xff]  ;;  %v378_v42 = vld [vmem:[#allocation5 + $0x208] sm:$0xff] }
  0x5d   : > { %670 = vmatpush.msrb.mxu2 %v487_v6  ;;  %693 = vmatpush.msrb.mxu3 %v488_v7  ;;  %v379_v43 = vld [vmem:[#allocation5 + $0x210] sm:$0xff]  ;;  %v380_v44 = vld [vmem:[#allocation5 + $0x218] sm:$0xff]  ;;  %v365_v45 = vld [vmem:[#allocation5 + $0x1a0] sm:$0xff] }
  0x5e   : > { %625 = vmatpush.msrb.mxu0 %v473_v8  ;;  %648 = vmatpush.msrb.mxu1 %v474_v9  ;;  %v366_v46 = vld [vmem:[#allocation5 + $0x1a8] sm:$0xff]  ;;  %v367_v47 = vld [vmem:[#allocation5 + $0x1b0] sm:$0xff]  ;;  %v368_v48 = vld [vmem:[#allocation5 + $0x1b8] sm:$0xff] }
  0x5f   : > { %671 = vmatpush.msrb.mxu2 %v475_v10  ;;  %694 = vmatpush.msrb.mxu3 %v476_v11  ;;  %v2347_v49 = vld [vmem:[%s2325_s28 + $0x8] sm:$0xff]  ;;  %v353_v50 = vld [vmem:[#allocation5 + $0x140] sm:$0xff]  ;;  %v355_v52 = vld [vmem:[#allocation5 + $0x150] sm:$0xff] }
  0x60   : > { %626 = vmatpush.msrb.mxu0 %v461_v12  ;;  %649 = vmatpush.msrb.mxu1 %v462_v13  ;;  %v354_v51 = vld [vmem:[#allocation5 + $0x148] sm:$0xff]  ;;  %v356_v53 = vld [vmem:[#allocation5 + $0x158] sm:$0xff]  ;;  %v341_v55 = vld [vmem:[#allocation5 + $0xe0] sm:$0xff] }
  0x61   : > { %672 = vmatpush.msrb.mxu2 %v463_v14  ;;  %695 = vmatpush.msrb.mxu3 %v464_v15  ;;  %v342_v54 = vld [vmem:[#allocation5 + $0xe8] sm:$0xff]  ;;  %v343_v56 = vld [vmem:[#allocation5 + $0xf0] sm:$0xff]  ;;  %v344_v57 = vld [vmem:[#allocation5 + $0xf8] sm:$0xff] }
  0x62   : > { %627 = vmatpush.msrb.mxu0 %v449_v16  ;;  %650 = vmatpush.msrb.mxu1 %v450_v17  ;;  %v329_v58 = vld [vmem:[#allocation5 + $0x80] sm:$0xff]  ;;  %v330_v59 = vld [vmem:[#allocation5 + $0x88] sm:$0xff]  ;;  %v331_v60 = vld [vmem:[#allocation5 + $0x90] sm:$0xff] }
  0x63   : > { %673 = vmatpush.msrb.mxu2 %v451_v18  ;;  %696 = vmatpush.msrb.mxu3 %v452_v19  ;;  %v332_v61 = vld [vmem:[#allocation5 + $0x98] sm:$0xff]  ;;  %v317_v62 = vld [vmem:[#allocation5 + $0x20] sm:$0xff]  ;;  %v318_v63 = vld [vmem:[#allocation5 + $0x28] sm:$0xff] }
  0x64   : > { %628 = vmatpush.msrb.mxu0 %v437_v20  ;;  %651 = vmatpush.msrb.mxu1 %v438_v21  ;;  %v319_v0 = vld [vmem:[#allocation5 + $0x30] sm:$0xff]  ;;  %v320_v1 = vld [vmem:[#allocation5 + $0x38] sm:$0xff]  ;;  %v501_v2 = vld [vmem:[#allocation5 + $0x5e0] sm:$0xff] }
  0x65   : > { %674 = vmatpush.msrb.mxu2 %v439_v22  ;;  %697 = vmatpush.msrb.mxu3 %v440_v23  ;;  %v502_v3 = vld [vmem:[#allocation5 + $0x5e8] sm:$0xff]  ;;  %v503_v4 = vld [vmem:[#allocation5 + $0x5f0] sm:$0xff]  ;;  %v504_v5 = vld [vmem:[#allocation5 + $0x5f8] sm:$0xff] }
  0x66   : > { %629 = vmatpush.msrb.mxu0 %v425_v24  ;;  %652 = vmatpush.msrb.mxu1 %v426_v25  ;;  %v490_v6 = vld [vmem:[#allocation5 + $0x588] sm:$0xff]  ;;  %v489_v7 = vld [vmem:[#allocation5 + $0x580] sm:$0xff]  ;;  %v491_v8 = vld [vmem:[#allocation5 + $0x590] sm:$0xff] }
  0x67   : > { %675 = vmatpush.msrb.mxu2 %v427_v26  ;;  %698 = vmatpush.msrb.mxu3 %v428_v27  ;;  %v492_v9 = vld [vmem:[#allocation5 + $0x598] sm:$0xff]  ;;  %v477_v10 = vld [vmem:[#allocation5 + $0x520] sm:$0xff]  ;;  %v478_v11 = vld [vmem:[#allocation5 + $0x528] sm:$0xff] }
  0x68   : > { %630 = vmatpush.msrb.mxu0 %v413_v28  ;;  %653 = vmatpush.msrb.mxu1 %v414_v29  ;;  %v479_v12 = vld [vmem:[#allocation5 + $0x530] sm:$0xff]  ;;  %v480_v13 = vld [vmem:[#allocation5 + $0x538] sm:$0xff]  ;;  %v465_v14 = vld [vmem:[#allocation5 + $0x4c0] sm:$0xff] }
  0x69   : > { %676 = vmatpush.msrb.mxu2 %v415_v30  ;;  %699 = vmatpush.msrb.mxu3 %v416_v31  ;;  %v466_v15 = vld [vmem:[#allocation5 + $0x4c8] sm:$0xff]  ;;  %v467_v16 = vld [vmem:[#allocation5 + $0x4d0] sm:$0xff]  ;;  %v468_v17 = vld [vmem:[#allocation5 + $0x4d8] sm:$0xff] }
  0x6a   : > { %593 = vmatmul.f32.vlgmr.msra.gmra.mxu2 %v2340_v32  ;;  %616 = vmatmul.f32.vlgmr.msra.gmra.mxu3 %v2340_v32  ;;  %v453_v18 = vld [vmem:[#allocation5 + $0x460] sm:$0xff]  ;;  %v454_v19 = vld [vmem:[#allocation5 + $0x468] sm:$0xff]  ;;  %v455_v20 = vld [vmem:[#allocation5 + $0x470] sm:$0xff] }
  0x6b   : > { %631 = vmatpush.msrb.mxu0 %v401_v33  ;;  %654 = vmatpush.msrb.mxu1 %v402_v34  ;;  %v456_v21 = vld [vmem:[#allocation5 + $0x478] sm:$0xff]  ;;  %v442_v22 = vld [vmem:[#allocation5 + $0x408] sm:$0xff]  ;;  %v441_v23 = vld [vmem:[#allocation5 + $0x400] sm:$0xff] }
  0x6c   : > { %677 = vmatpush.msrb.mxu2 %v403_v35  ;;  %700 = vmatpush.msrb.mxu3 %v404_v36  ;;  %v443_v24 = vld [vmem:[#allocation5 + $0x410] sm:$0xff]  ;;  %v444_v25 = vld [vmem:[#allocation5 + $0x418] sm:$0xff]  ;;  %v429_v26 = vld [vmem:[#allocation5 + $0x3a0] sm:$0xff] }
  0x6d   : > { %547 = vmatmul.f32.vlgmr.msra.gmra.mxu0 %v2340_v32  ;;  %655 = vmatpush.msrb.mxu1 %v390_v37  ;;  %v430_v27 = vld [vmem:[#allocation5 + $0x3a8] sm:$0xff]  ;;  %v431_v28 = vld [vmem:[#allocation5 + $0x3b0] sm:$0xff]  ;;  %v432_v29 = vld [vmem:[#allocation5 + $0x3b8] sm:$0xff] }
  0x6e   : > { %632 = vmatpush.msrb.mxu0 %v389_v38  ;;  %678 = vmatpush.msrb.mxu2 %v391_v39  ;;  %v417_v30 = vld [vmem:[#allocation5 + $0x340] sm:$0xff]  ;;  %v418_v31 = vld [vmem:[#allocation5 + $0x348] sm:$0xff]  ;;  %v419_v33 = vld [vmem:[#allocation5 + $0x350] sm:$0xff] }
  0x6f   : > { %701 = vmatpush.msrb.mxu3 %v392_v40  ;;  %570 = vmatmul.f32.vlgmr.msra.gmra.mxu1 %v2340_v32  ;;  %v420_v34 = vld [vmem:[#allocation5 + $0x358] sm:$0xff]  ;;  %v405_v35 = vld [vmem:[#allocation5 + $0x2e0] sm:$0xff]  ;;  %v406_v36 = vld [vmem:[#allocation5 + $0x2e8] sm:$0xff] }
  0x70   : > { %633 = vmatpush.msrb.mxu0 %v377_v41  ;;  %656 = vmatpush.msrb.mxu1 %v378_v42  ;;  %v407_v37 = vld [vmem:[#allocation5 + $0x2f0] sm:$0xff]  ;;  %v408_v38 = vld [vmem:[#allocation5 + $0x2f8] sm:$0xff]  ;;  %v393_v39 = vld [vmem:[#allocation5 + $0x280] sm:$0xff] }
  0x71   : > { %679 = vmatpush.msrb.mxu2 %v379_v43  ;;  %702 = vmatpush.msrb.mxu3 %v380_v44  ;;  %v394_v40 = vld [vmem:[#allocation5 + $0x288] sm:$0xff]  ;;  %v395_v41 = vld [vmem:[#allocation5 + $0x290] sm:$0xff]  ;;  %v396_v42 = vld [vmem:[#allocation5 + $0x298] sm:$0xff] }
  0x72   : > { %634 = vmatpush.msrb.mxu0 %v365_v45  ;;  %657 = vmatpush.msrb.mxu1 %v366_v46  ;;  %v381_v43 = vld [vmem:[#allocation5 + $0x220] sm:$0xff]  ;;  %v382_v44 = vld [vmem:[#allocation5 + $0x228] sm:$0xff]  ;;  %v383_v45 = vld [vmem:[#allocation5 + $0x230] sm:$0xff] }
  0x73   : > { %680 = vmatpush.msrb.mxu2 %v367_v47  ;;  %703 = vmatpush.msrb.mxu3 %v368_v48  ;;  %v384_v46 = vld [vmem:[#allocation5 + $0x238] sm:$0xff]  ;;  %v369_v47 = vld [vmem:[#allocation5 + $0x1c0] sm:$0xff]  ;;  %v370_v48 = vld [vmem:[#allocation5 + $0x1c8] sm:$0xff] }
  0x74   : > { %596 = vmatmul.f32.gmra.mxu2 %v2347_v49  ;;  %619 = vmatmul.f32.gmra.mxu3 %v2347_v49 }
  0x75   : > { %635 = vmatpush.msrb.mxu0 %v353_v50  ;;  %658 = vmatpush.msrb.mxu1 %v354_v51  ;;  %v371_v50 = vld [vmem:[#allocation5 + $0x1d0] sm:$0xff]  ;;  %v372_v51 = vld [vmem:[#allocation5 + $0x1d8] sm:$0xff] }
  0x76   : > { %681 = vmatpush.msrb.mxu2 %v355_v52  ;;  %704 = vmatpush.msrb.mxu3 %v356_v53  ;;  %v357_v52 = vld [vmem:[#allocation5 + $0x160] sm:$0xff]  ;;  %v358_v53 = vld [vmem:[#allocation5 + $0x168] sm:$0xff] }
  0x77   : > { %550 = vmatmul.f32.gmra.mxu0 %v2347_v49  ;;  %659 = vmatpush.msrb.mxu1 %v342_v54  ;;  %v359_v54 = vld [vmem:[#allocation5 + $0x170] sm:$0xff] }
  0x78   : > { %636 = vmatpush.msrb.mxu0 %v341_v55  ;;  %682 = vmatpush.msrb.mxu2 %v343_v56  ;;  %v360_v55 = vld [vmem:[#allocation5 + $0x178] sm:$0xff]  ;;  %v345_v56 = vld [vmem:[#allocation5 + $0x100] sm:$0xff] }
  0x79   : > { %705 = vmatpush.msrb.mxu3 %v344_v57  ;;  %573 = vmatmul.f32.gmra.mxu1 %v2347_v49  ;;  %v346_v57 = vld [vmem:[#allocation5 + $0x108] sm:$0xff] }
  0x7a   : > { %637 = vmatpush.msrb.mxu0 %v329_v58  ;;  %660 = vmatpush.msrb.mxu1 %v330_v59  ;;  %v347_v58 = vld [vmem:[#allocation5 + $0x110] sm:$0xff]  ;;  %v348_v59 = vld [vmem:[#allocation5 + $0x118] sm:$0xff] }
  0x7b   : > { %683 = vmatpush.msrb.mxu2 %v331_v60  ;;  %706 = vmatpush.msrb.mxu3 %v332_v61  ;;  %v333_v60 = vld [vmem:[#allocation5 + $0xa0] sm:$0xff]  ;;  %v334_v61 = vld [vmem:[#allocation5 + $0xa8] sm:$0xff] }
  0x7c   : > { %638 = vmatpush.msrb.mxu0 %v317_v62  ;;  %661 = vmatpush.msrb.mxu1 %v318_v63  ;;  %v335_v62 = vld [vmem:[#allocation5 + $0xb0] sm:$0xff]  ;;  %v336_v63 = vld [vmem:[#allocation5 + $0xb8] sm:$0xff] }
  0x7d   : > { %684 = vmatpush.msrb.mxu2 %v319_v0  ;;  %707 = vmatpush.msrb.mxu3 %v320_v1  ;;  %v321_v0 = vld [vmem:[#allocation5 + $0x40] sm:$0xff]  ;;  %v322_v1 = vld [vmem:[#allocation5 + $0x48] sm:$0xff] }
  0x7e   : > { %685 = vmatmul.f32.vlgmr.msrb.gmra.mxu2 %v2340_v32  ;;  %708 = vmatmul.f32.vlgmr.msrb.gmra.mxu3 %v2340_v32 }
  0x7f   : > { %715 = vmatpush.msra.mxu0 %v501_v2  ;;  %738 = vmatpush.msra.mxu1 %v502_v3  ;;  %v323_v2 = vld [vmem:[#allocation5 + $0x50] sm:$0xff]  ;;  %v324_v3 = vld [vmem:[#allocation5 + $0x58] sm:$0xff] }
  0x80   : > { %761 = vmatpush.msra.mxu2 %v503_v4  ;;  %784 = vmatpush.msra.mxu3 %v504_v5  ;;  %v2369_v4 = vld [vmem:[#allocation10] sm:$0xff] }
  0x81   : > { %639 = vmatmul.f32.vlgmr.msrb.gmra.mxu0 %v2340_v32  ;;  %739 = vmatpush.msra.mxu1 %v490_v6  ;;  %v507_v5 = vperm.slane %v2369_v4, 0  ;;  %v508_v6 = vperm.slane %v2369_v4, 1 }
  0x82   : > { %716 = vmatpush.msra.mxu0 %v489_v7  ;;  %762 = vmatpush.msra.mxu2 %v491_v8  ;;  %v2373_v8 = vld [vmem:[#allocation7] ss:$8 sm:$0xf] }
  0x83   : > { %785 = vmatpush.msra.mxu3 %v492_v9  ;;  %662 = vmatmul.f32.vlgmr.msrb.gmra.mxu1 %v2340_v32  ;;  %v509_v9 = vperm.slane %v2369_v4, 2 }
  0x84   : > { %717 = vmatpush.msra.mxu0 %v477_v10  ;;  %740 = vmatpush.msra.mxu1 %v478_v11  ;;  %v978_v11 = vperm.slane %v2373_v8, 0 }
  0x85   : > { %763 = vmatpush.msra.mxu2 %v479_v12  ;;  %786 = vmatpush.msra.mxu3 %v480_v13  ;;  %v1003_v12 = vld [vmem:[#allocation7 + $0x3] ss:$8 sm:$0xf] }
  0x86   : > { %718 = vmatpush.msra.mxu0 %v465_v14  ;;  %741 = vmatpush.msra.mxu1 %v466_v15  ;;  %v2378_v13 = vperm.slane %v1003_v12, 0  ;;  %v979_v15 = vperm.slane %v2373_v8, 1 }
  0x87   : > { %764 = vmatpush.msra.mxu2 %v467_v16  ;;  %787 = vmatpush.msra.mxu3 %v468_v17  ;;  %v2381_v16 = vperm.slane %v1003_v12, 1 }
  0x88   : > { %688 = vmatmul.f32.gmra.mxu2 %v2347_v49  ;;  %711 = vmatmul.f32.gmra.mxu3 %v2347_v49 }
  0x89   : > { %719 = vmatpush.msra.mxu0 %v453_v18  ;;  %742 = vmatpush.msra.mxu1 %v454_v19 }
  0x8a   : > { %765 = vmatpush.msra.mxu2 %v455_v20  ;;  %788 = vmatpush.msra.mxu3 %v456_v21 }
  0x8b   : > { %642 = vmatmul.f32.gmra.mxu0 %v2347_v49  ;;  %743 = vmatpush.msra.mxu1 %v442_v22 }
  0x8c   : > { %720 = vmatpush.msra.mxu0 %v441_v23  ;;  %766 = vmatpush.msra.mxu2 %v443_v24  ;;  %v980_v24 = vperm.slane %v2373_v8, 2 }
  0x8d   : > { %789 = vmatpush.msra.mxu3 %v444_v25  ;;  %665 = vmatmul.f32.gmra.mxu1 %v2347_v49  ;;  %v2392_v25 = vperm.slane %v1003_v12, 2 }
  0x8e   : > { %721 = vmatpush.msra.mxu0 %v429_v26  ;;  %744 = vmatpush.msra.mxu1 %v430_v27 }
  0x8f   : > { %767 = vmatpush.msra.mxu2 %v431_v28  ;;  %790 = vmatpush.msra.mxu3 %v432_v29 }
  0x90   : > { %722 = vmatpush.msra.mxu0 %v417_v30  ;;  %745 = vmatpush.msra.mxu1 %v418_v31  ;;  %v981_v30 = vperm.slane %v2373_v8, 3 }
  0x91   : > { %768 = vmatpush.msra.mxu2 %v419_v33  ;;  %791 = vmatpush.msra.mxu3 %v420_v34  ;;  %v2401_v34 = vperm.slane %v1003_v12, 3 }
  0x92   : > { %723 = vmatpush.msra.mxu0 %v405_v35  ;;  %746 = vmatpush.msra.mxu1 %v406_v36 }
  0x93   : > { %769 = vmatpush.msra.mxu2 %v407_v37  ;;  %792 = vmatpush.msra.mxu3 %v408_v38  ;;  %v511_v38 = vperm.slane %v2369_v4, 4 }
  0x94   : > { %724 = vmatpush.msra.mxu0 %v393_v39  ;;  %747 = vmatpush.msra.mxu1 %v394_v40  ;;  %v2409_v39 = vld [vmem:[#allocation7 + $0x1] ss:$8 sm:$0xf] }
  0x95   : > { %770 = vmatpush.msra.mxu2 %v395_v41  ;;  %793 = vmatpush.msra.mxu3 %v396_v42  ;;  %v2415_v42 = vld [vmem:[#allocation7 + $0x4] ss:$8 sm:$0xf] }
  0x96   : > { %725 = vmatpush.msra.mxu0 %v381_v43  ;;  %748 = vmatpush.msra.mxu1 %v382_v44 }
  0x97   : > { %771 = vmatpush.msra.mxu2 %v383_v45  ;;  %794 = vmatpush.msra.mxu3 %v384_v46 }
  0x98   : > { %726 = vmatpush.msra.mxu0 %v369_v47  ;;  %749 = vmatpush.msra.mxu1 %v370_v48  ;;  %v512_v47 = vperm.slane %v2369_v4, 5 }
  0x99   : > { %772 = vmatpush.msra.mxu2 %v371_v50  ;;  %795 = vmatpush.msra.mxu3 %v372_v51 }
  0x9a   : > { %727 = vmatpush.msra.mxu0 %v357_v52  ;;  %750 = vmatpush.msra.mxu1 %v358_v53  ;;  %v2430_v53 = vperm.slane %v2415_v42, 0 }
  0x9b   : > { %773 = vmatpush.msra.mxu2 %v359_v54  ;;  %796 = vmatpush.msra.mxu3 %v360_v55  ;;  %v2432_v54 = vld [vmem:[#allocation7 + $0x7] ss:$8 sm:$0xf] }
  0x9c   : > { %728 = vmatpush.msra.mxu0 %v345_v56  ;;  %751 = vmatpush.msra.mxu1 %v346_v57 }
  0x9d   : > { %774 = vmatpush.msra.mxu2 %v347_v58  ;;  %797 = vmatpush.msra.mxu3 %v348_v59  ;;  %v2498_v58 = vperm.slane %v2415_v42, 1 }
  0x9e   : > { %729 = vmatpush.msra.mxu0 %v333_v60  ;;  %752 = vmatpush.msra.mxu1 %v334_v61 }
  0x9f   : > { %775 = vmatpush.msra.mxu2 %v335_v62  ;;  %798 = vmatpush.msra.mxu3 %v336_v63  ;;  %v2448_v62 = vperm.slane %v2432_v54, 0 }
  0xa0   : > { %730 = vmatpush.msra.mxu0 %v321_v0  ;;  %753 = vmatpush.msra.mxu1 %v322_v1 }
  0xa1   : > { %776 = vmatpush.msra.mxu2 %v323_v2  ;;  %799 = vmatpush.msra.mxu3 %v324_v3 }
  0xa2   : > { %731 = vmatmul.f32.vlgmr.msra.gmra.mxu0 %v2340_v32  ;;  %754 = vmatmul.f32.vlgmr.msra.gmra.mxu1 %v2340_v32 }
  0xa3   : > { %777 = vmatmul.f32.vlgmr.msra.gmra.mxu2 %v2340_v32  ;;  %800 = vmatmul.f32.vlgmr.msra.gmra.mxu3 %v2340_v32  ;;  %v510_v32 = vperm.slane %v2369_v4, 3 }
  0xaa   : > { %734 = vmatmul.f32.gmra.mxu0 %v2347_v49  ;;  %757 = vmatmul.f32.gmra.mxu1 %v2347_v49 }
  0xab   : > { %780 = vmatmul.f32.gmra.mxu2 %v2347_v49  ;;  %803 = vmatmul.f32.gmra.mxu3 %v2347_v49  ;;  %v1075_v49 = vld [vmem:[#allocation7 + $0x6] ss:$8 sm:$0xf] }
  0xac   : > { %v2383_v18 = vperm.slane %v1075_v49, 0  ;;  %v2387_v20 = vperm.slane %v1075_v49, 1  ;;  %v2398_v29 = vperm.slane %v1075_v49, 2  ;;  %v2403_v35 = vperm.slane %v1075_v49, 3 }
  0xea   : > { %v548_v7 = vpop.f32.mrf.mxu0 }
  0xeb   : > { %v549_v10 = vadd.f32 %v548_v7, %v507_v5 }
  0xec   : > { %v571_v14 = vpop.f32.mrf.mxu1 }
  0xed   : > { %v807_v17 = vmax.f32 %v549_v10, 0.0  ;;  %v572_v19 = vadd.f32 %v571_v14, %v508_v6  ;;  %v594_v21 = vpop.f32.mrf.mxu2  ;;  %v617_v22 = vpop.f32.mrf.mxu3 }
  0xee   : > { %v595_v23 = vadd.f32 %v594_v21, %v509_v9  ;;  %v618_v26 = vadd.f32 %v617_v22, %v510_v32 }
  0xef   : > { %v2396_v27 = vmin.f32 %v807_v17, 6.0  ;;  %v808_v28 = vmax.f32 %v572_v19, 0.0 }
  0xf0   : > { %v809_v31 = vmax.f32 %v595_v23, 0.0  ;;  %v810_v33 = vmax.f32 %v618_v26, 0.0 }
  0xf1   : > { %v880_v36 = vrot.slane %v2396_v27, 7  ;;  %v2406_v37 = vmin.f32 %v808_v28, 6.0 }
  0xf2   : > { %v2411_v40 = vmin.f32 %v809_v31, 6.0  ;;  %v2413_v41 = vmin.f32 %v810_v33, 6.0 }
  0xf3   : > { %v952_v44 = vsel %vm879_vm0, 0.0, %v880_v36  ;;  %v881_v45 = vrot.slane %v2406_v37, 7 }
  0xf4   : > { %v2423_v48 = vmul.f32 %v2378_v13, %v952_v44  ;;  %v2426_v50 = vmul.f32 %v2383_v18, %v952_v44  ;;  %v882_v51 = vrot.slane %v2411_v40, 7  ;;  %v551_v52 = vpop.f32.mrf.mxu0  ;;  %v883_v56 = vrot.slane %v2413_v41, 7 }
  0xf5   : > { %v953_v55 = vsel %vm879_vm0, 0.0, %v881_v45  ;;  %v552_v57 = vadd.f32 %v551_v52, %v507_v5  ;;  %v2441_v59 = vmul.f32 %v978_v11, %v952_v44 }
  0xf6   : > { %v1038_v60 = vrot.slane %v2423_v48, 1  ;;  %v2445_v61 = vmul.f32 %v2381_v16, %v953_v55  ;;  %v2451_v63 = vmul.f32 %v2387_v20, %v953_v55  ;;  %v954_v0 = vsel %vm879_vm0, 0.0, %v882_v51  ;;  %v574_v19 = vpop.f32.mrf.mxu1 }
  0xf7   : > { %v955_v1 = vsel %vm879_vm0, 0.0, %v883_v56  ;;  %v819_v2 = vmax.f32 %v552_v57, 0.0  ;;  %v1110_v3 = vrot.slane %v2426_v50, 2  ;;  %v2462_v5 = vmul.f32 %v979_v15, %v953_v55  ;;  %v597_v27 = vpop.f32.mrf.mxu2  ;;  %v620_v28 = vpop.f32.mrf.mxu3 }
  0xf8   : > { %v2465_v7 = vmul.f32 %v2392_v25, %v954_v0  ;;  %v2468_v10 = vmul.f32 %v2398_v29, %v954_v0  ;;  %v1041_v12 = vrot.slane %v2445_v61, 1  ;;  %v2473_v49 = vmul.f32 %v980_v24, %v954_v0 }
  0xf9   : > { %v2476_v14 = vmul.f32 %v2401_v34, %v955_v1  ;;  %v2479_v17 = vmul.f32 %v2403_v35, %v955_v1  ;;  %v1113_v21 = vrot.slane %v2451_v63, 2  ;;  %v2484_v22 = vmul.f32 %v981_v30, %v955_v1 }
  0xfa   : > { %v843_v23 = vmin.f32 %v819_v2, 6.0  ;;  %v575_v26 = vadd.f32 %v574_v19, %v508_v6  ;;  %v598_v44 = vadd.f32 %v597_v27, %v509_v9  ;;  %v621_v52 = vadd.f32 %v620_v28, %v510_v32 }
  0xfb   : > { %v2503_v32 = vperm.slane %v2432_v54, 1 }
  0xfc   : > { %v892_v0 = vrot.slane %v843_v23, 7  ;;  %v820_v1 = vmax.f32 %v575_v26, 0.0  ;;  %v821_v6 = vmax.f32 %v598_v44, 0.0  ;;  %v822_v2 = vmax.f32 %v621_v52, 0.0 }
  0xfe   : > { %v893_v33 = vsel %vm879_vm0, %v880_v36, %v892_v0  ;;  %v964_v9 = vsel %vm879_vm0, %v892_v0, 0.0  ;;  %v844_v27 = vmin.f32 %v820_v1, 6.0  ;;  %v845_v36 = vmin.f32 %v821_v6, 6.0  ;;  %v640_v0 = vpop.f32.mrf.mxu0 }
  0xff   : > { %v990_v28 = vmul.f32 %v978_v11, %v893_v33  ;;  %v1017_v23 = vmul.f32 %v2378_v13, %v893_v33  ;;  %v1021_v26 = vmul.f32 %v2378_v13, %v964_v9  ;;  %v2510_v44 = vmul.f32 %v2383_v18, %v893_v33 }
 0x100   : > { %v1093_v52 = vmul.f32 %v2383_v18, %v964_v9  ;;  %v894_v19 = vrot.slane %v844_v27, 7  ;;  %v846_v57 = vmin.f32 %v822_v2, 6.0  ;;  %v641_v11 = vadd.f32 %v640_v0, %v511_v38  ;;  %v663_v8 = vpop.f32.mrf.mxu1 }
 0x101   : > { %v1039_v1 = vrot.slane %v1017_v23, 1  ;;  %v1050_v55 = vrot.slane %v1021_v26, 1  ;;  %v1111_v31 = vrot.slane %v2510_v44, 2  ;;  %v896_v46 = vrot.slane %v845_v36, 7 }
 0x102   : > { %v1122_v43 = vrot.slane %v1093_v52, 2  ;;  %v895_v13 = vsel %vm879_vm0, %v881_v45, %v894_v19  ;;  %v965_v33 = vsel %vm879_vm0, %v894_v19, 0.0  ;;  %v1151_v36 = vperm.slane %v2409_v39, 2 }
 0x103   : > { %v1051_v18 = vsel %vm1037_vm1, %v1039_v1, %v1050_v55  ;;  %v991_v6 = vmul.f32 %v979_v15, %v895_v13  ;;  %v1018_v2 = vmul.f32 %v2381_v16, %v895_v13  ;;  %v1022_v9 = vmul.f32 %v2381_v16, %v965_v33 }
 0x104   : > { %v1070_v27 = vadd.f32 %v1051_v18, %v990_v28  ;;  %v1123_v23 = vsel %vm1109_vm2, %v1111_v31, %v1122_v43  ;;  %v1090_v26 = vmul.f32 %v2387_v20, %v895_v13  ;;  %v1094_v37 = vmul.f32 %v2387_v20, %v965_v33 }
 0x105   : > { %v1042_v45 = vrot.slane %v1018_v2, 1  ;;  %v1052_v44 = vrot.slane %v1022_v9, 1  ;;  %v897_v55 = vsel %vm879_vm0, %v882_v51, %v896_v46  ;;  %v966_v19 = vsel %vm879_vm0, %v896_v46, 0.0 }
 0x106   : > { %v1114_v15 = vrot.slane %v1090_v26, 2  ;;  %v1124_v52 = vrot.slane %v1094_v37, 2  ;;  %v2534_v16 = vperm.slane %v2415_v42, 2  ;;  %v1019_v28 = vmul.f32 %v2392_v25, %v897_v55 }
 0x107   : > { %v1053_v43 = vsel %vm1037_vm1, %v1042_v45, %v1052_v44  ;;  %v1023_v20 = vmul.f32 %v2392_v25, %v966_v19  ;;  %v1091_v0 = vmul.f32 %v2398_v29, %v897_v55  ;;  %v2540_v40 = vadd.f32 %v1123_v23, %v1070_v27 }
 0x108   : > { %v992_v46 = vmul.f32 %v980_v24, %v897_v55  ;;  %v1095_v51 = vmul.f32 %v2398_v29, %v966_v19  ;;  %v898_v13 = vrot.slane %v846_v57, 7  ;;  %v1071_v33 = vadd.f32 %v1053_v43, %v991_v6 }
 0x109   : > { %v1045_v18 = vrot.slane %v1019_v28, 1  ;;  %v1054_v2 = vrot.slane %v1023_v20, 1  ;;  %v811_v9 = vmax.f32 %v641_v11, 0.0  ;;  %v1117_v26 = vrot.slane %v1091_v0, 2 }
 0x10a   : > { %v1126_v37 = vrot.slane %v1095_v51, 2  ;;  %v899_v25 = vsel %vm879_vm0, %v883_v56, %v898_v13  ;;  %v967_v44 = vsel %vm879_vm0, %v898_v13, 0.0  ;;  %v1125_v27 = vsel %vm1109_vm2, %v1114_v15, %v1124_v52  ;;  %v709_v13 = vpop.f32.mrf.mxu3 }
 0x10b   : > { %v1055_v23 = vsel %vm1037_vm1, %v1045_v18, %v1054_v2  ;;  %v1020_v24 = vmul.f32 %v2401_v34, %v899_v25  ;;  %v1024_v29 = vmul.f32 %v2401_v34, %v967_v44  ;;  %v993_v11 = vmul.f32 %v981_v30, %v899_v25  ;;  %v686_v30 = vpop.f32.mrf.mxu2 }
 0x10c   : > { %v1072_v57 = vadd.f32 %v1055_v23, %v992_v46  ;;  %v1092_v6 = vmul.f32 %v2403_v35, %v899_v25  ;;  %v1096_v41 = vmul.f32 %v2403_v35, %v967_v44  ;;  %v2557_v19 = vmin.f32 %v811_v9, 6.0 }
 0x10d   : > { %v1048_v55 = vrot.slane %v1020_v24, 1  ;;  %v1056_v56 = vrot.slane %v1024_v29, 1  ;;  %v1040_v52 = vsel %vm1037_vm1, %v1038_v60, %v1039_v1  ;;  %v1127_v43 = vsel %vm1109_vm2, %v1117_v26, %v1126_v37 }
 0x10e   : > { %v1120_v28 = vrot.slane %v1092_v6, 2  ;;  %v1128_v34 = vrot.slane %v1096_v41, 2  ;;  %v1066_v20 = vadd.f32 %v1040_v52, %v2441_v59  ;;  %v884_v35 = vrot.slane %v2557_v19, 7 }
 0x10f   : > { %v1057_v0 = vsel %vm1037_vm1, %v1048_v55, %v1056_v56  ;;  %v1112_v46 = vsel %vm1109_vm2, %v1110_v3, %v1111_v31  ;;  %v664_v48 = vadd.f32 %v663_v8, %v512_v47  ;;  %v1043_v59 = vsel %vm1037_vm1, %v1041_v12, %v1042_v45 }
 0x110   : > { %v1073_v60 = vadd.f32 %v1057_v0, %v993_v11  ;;  %v1129_v1 = vsel %vm1109_vm2, %v1120_v28, %v1128_v34  ;;  %v1138_v51 = vadd.f32 %v1112_v46, %v1066_v20  ;;  %v956_v2 = vsel %vm879_vm0, 0.0, %v884_v35 }
 0x111   : > { %v812_v9 = vmax.f32 %v664_v48, 0.0  ;;  %v1067_v50 = vadd.f32 %v1043_v59, %v2462_v5  ;;  %v1115_v3 = vsel %vm1109_vm2, %v1113_v21, %v1114_v15  ;;  %v2582_v31 = vadd.f32 %v1125_v27, %v1071_v33 }
 0x112   : > { %v3161_v37 = vperm.slane %v2409_v39, 0  ;;  %v2587_v61 = vmul.f32 %v2430_v53, %v956_v2  ;;  %v2590_v12 = vmul.f32 %v2448_v62, %v956_v2  ;;  %v2592_v45 = vadd.f32 %v1127_v43, %v1072_v57 }
 0x113   : > { %v2594_v44 = vmin.f32 %v812_v9, 6.0  ;;  %v3162_v5 = vperm.slane %v2369_v4, 6  ;;  %v3163_v21 = vrot.slane %v2465_v7, 1  ;;  %v2601_v33 = vadd.f32 %v1129_v1, %v1073_v60  ;;  %v689_v48 = vpop.f32.mrf.mxu2 }
 0x114   : > { %v1157_v25 = vmul.f32 %v3161_v37, %v956_v2  ;;  %v1139_v23 = vadd.f32 %v1115_v3, %v1067_v50  ;;  %v1208_v29 = vrot.slane %v2587_v61, 1  ;;  %v3164_v6 = vrot.slane %v2468_v10, 2  ;;  %v712_v50 = vpop.f32.mrf.mxu3  ;;  %v1534_v3 = vld [vmem:[#allocation8 + $0x78] sm:$0xff] }
 0x115   : > { %v687_v63 = vadd.f32 %v686_v30, %v3162_v5  ;;  %v1046_v15 = vsel %vm1037_vm1, %v3163_v21, %v1045_v18  ;;  %v885_v57 = vrot.slane %v2594_v44, 7  ;;  %v1279_v7 = vrot.slane %v2590_v12, 2  ;;  %v643_v30 = vpop.f32.mrf.mxu0  ;;  %v1550_v37 = vld [vmem:[#allocation8 + $0xf8] sm:$0xff]  ;;  %1586 = vmatpush.msrb.mxu0 %v1534_v3  ;;  %v1540_v12 = vld [vmem:[#allocation8 + $0xa8] sm:$0xff] }
 0x116   : > { %v2603_v27 = vadd.f32 %v1157_v25, %v1138_v51  ;;  %v1068_v24 = vadd.f32 %v1046_v15, %v2473_v49  ;;  %v1118_v41 = vsel %vm1109_vm2, %v3164_v6, %v1117_v26  ;;  %v3165_v18 = vperm.slane %v2369_v4, 7  ;;  %1609 = vmatpush.msrb.mxu1 %v1550_v37  ;;  %v1582_v44 = vld [vmem:[#allocation8 + $0x1f8] sm:$0xff] }
 0x117   : > { %v813_v11 = vmax.f32 %v687_v63, 0.0  ;;  %v3166_v52 = vrot.slane %v2476_v14, 1  ;;  %v3167_v49 = vrot.slane %v2479_v17, 2  ;;  %v957_v20 = vsel %vm879_vm0, 0.0, %v885_v57  ;;  %1655 = vmatpush.msrb.mxu3 %v1582_v44 }
 0x118   : > { %v710_v56 = vadd.f32 %v709_v13, %v3165_v18  ;;  %v2626_v26 = vperm.slane %v2432_v54, 2  ;;  %v3168_v14 = vperm.slane %v2409_v39, 1  ;;  %v1152_v17 = vperm.slane %v2409_v39, 3 }
 0x119   : > { %v1049_v43 = vsel %vm1037_vm1, %v3166_v52, %v1048_v55  ;;  %v1121_v34 = vsel %vm1109_vm2, %v3167_v49, %v1120_v28  ;;  %v2623_v10 = vmin.f32 %v813_v11, 6.0  ;;  %v1140_v55 = vadd.f32 %v1118_v41, %v1068_v24  ;;  %v666_v28 = vpop.f32.mrf.mxu1  ;;  %v1549_v11 = vld [vmem:[#allocation8 + $0xf0] sm:$0xff]  ;;  %v2669_v52 = vld [vmem:[#allocation10 + $0x8] sm:$0xf] }
 0x11a   : > { %v1069_v8 = vadd.f32 %v1049_v43, %v2484_v22  ;;  %v1158_v0 = vmul.f32 %v3168_v14, %v957_v20  ;;  %v814_v46 = vmax.f32 %v710_v56, 0.0  ;;  %v2633_v60 = vmul.f32 %v2498_v58, %v957_v20  ;;  %1610 = vmatpush.msrb.mxu1 %v1549_v11 }
 0x11b   : > { %v2636_v1 = vmul.f32 %v2503_v32, %v957_v20  ;;  %v886_v51 = vrot.slane %v2623_v10, 7  ;;  %v2644_v2 = vperm.slane %v2415_v42, 3  ;;  %v2647_v9 = vperm.slane %v2432_v54, 3 }
 0x11c   : > { %v1141_v59 = vadd.f32 %v1121_v34, %v1069_v8  ;;  %v2639_v22 = vadd.f32 %v1158_v0, %v1139_v23  ;;  %v2641_v13 = vmin.f32 %v814_v46, 6.0  ;;  %v644_v5 = vadd.f32 %v643_v30, %v511_v38  ;;  %v1533_v38 = vld [vmem:[#allocation8 + $0x70] sm:$0xff] }
 0x11d   : > { %v958_v25 = vsel %vm879_vm0, 0.0, %v886_v51  ;;  %v667_v63 = vadd.f32 %v666_v28, %v512_v47  ;;  %v3169_v21 = vperm.slane %v2369_v4, 6  ;;  %v713_v56 = vadd.f32 %v712_v50, %v3165_v18  ;;  %1587 = vmatpush.msrb.mxu0 %v1533_v38  ;;  %v1541_v50 = vld [vmem:[#allocation8 + $0xb0] sm:$0xff] }
 0x11e   : > { %v1159_v54 = vmul.f32 %v1151_v36, %v958_v25  ;;  %v2661_v15 = vmul.f32 %v2534_v16, %v958_v25  ;;  %v2664_v23 = vmul.f32 %v2626_v26, %v958_v25  ;;  %v887_v24 = vrot.slane %v2641_v13, 7 }
 0x11f   : > { %v690_v42 = vadd.f32 %v689_v48, %v3169_v21  ;;  %v823_v6 = vmax.f32 %v644_v5, 0.0  ;;  %v824_v47 = vmax.f32 %v667_v63, 0.0  ;;  %v1211_v43 = vrot.slane %v2633_v60, 1  ;;  %v732_v48 = vpop.f32.mrf.mxu0  ;;  %v1544_v63 = vld [vmem:[#allocation8 + $0xc8] sm:$0xff]  ;;  %v1563_v5 = vld [vmem:[#allocation8 + $0x160] sm:$0xff] }
 0x120   : > { %v1282_v49 = vrot.slane %v2636_v1, 2  ;;  %v2673_v34 = vadd.f32 %v1159_v54, %v1140_v55  ;;  %v959_v20 = vsel %vm879_vm0, 0.0, %v887_v24  ;;  %v826_v28 = vmax.f32 %v713_v56, 0.0  ;;  %v1523_v60 = vld [vmem:[#allocation8 + $0x20] sm:$0xff]  ;;  %v1558_v1 = vld [vmem:[#allocation8 + $0x138] sm:$0xff] }
 0x121   : > { %v825_v41 = vmax.f32 %v690_v42, 0.0  ;;  %v1160_v8 = vmul.f32 %v1152_v17, %v959_v20  ;;  %v2681_v4 = vmul.f32 %v2644_v2, %v959_v20  ;;  %v2684_v30 = vmul.f32 %v2647_v9, %v959_v20  ;;  %v2712_v20 = vld [vmem:[#allocation7 + $0x2] ss:$8 sm:$0xf] }
 0x122   : > { %v847_v14 = vmin.f32 %v823_v6, 6.0  ;;  %v848_v0 = vmin.f32 %v824_v47, 6.0  ;;  %v3152_v55 = vperm.slane %v2669_v52, 0  ;;  %v2697_v11 = vmin.f32 %v826_v28, 6.0  ;;  %v1548_v47 = vld [vmem:[#allocation8 + $0xe8] sm:$0xff]  ;;  %v1547_v28 = vld [vmem:[#allocation8 + $0xe0] sm:$0xff] }
 0x123   : > { %v849_v46 = vmin.f32 %v825_v41, 6.0  ;;  %v2689_v37 = vadd.f32 %v1160_v8, %v1141_v59  ;;  %v1532_v59 = vld [vmem:[#allocation8 + $0x68] sm:$0xff]  ;;  %v3170_v41 = vperm.slane %v2409_v39, 0  ;;  %1611 = vmatpush.msrb.mxu1 %v1548_v47  ;;  %v1546_v47 = vld [vmem:[#allocation8 + $0xd8] sm:$0xff] }
 0x124   : > { %v900_v25 = vrot.slane %v847_v14, 7  ;;  %v902_v21 = vrot.slane %v848_v0, 7  ;;  %v2701_v6 = vadd.f32 %v732_v48, %v3152_v55  ;;  %1588 = vmatpush.msrb.mxu0 %v1532_v59  ;;  %v1566_v48 = vld [vmem:[#allocation8 + $0x178] sm:$0xff] }
 0x125   : > { %v904_v42 = vrot.slane %v849_v46, 7  ;;  %1632 = vmatpush.msrb.mxu2 %v1566_v48  ;;  %1612 = vmatpush.msrb.mxu1 %v1547_v28  ;;  %v2739_v48 = vld [vmem:[#allocation7 + $0x5] ss:$8 sm:$0xf] }
 0x126   : > { %v901_v54 = vsel %vm879_vm0, %v884_v35, %v900_v25  ;;  %v968_v38 = vsel %vm879_vm0, %v900_v25, 0.0  ;;  %v903_v14 = vsel %vm879_vm0, %v885_v57, %v902_v21  ;;  %v969_v0 = vsel %vm879_vm0, %v902_v21, 0.0 }
 0x127   : > { %v1161_v18 = vmul.f32 %v3170_v41, %v901_v54  ;;  %v2706_v56 = vmul.f32 %v2430_v53, %v901_v54  ;;  %v1192_v19 = vmul.f32 %v2430_v53, %v968_v38  ;;  %v2710_v35 = vmul.f32 %v2448_v62, %v901_v54  ;;  %v1531_v53 = vld [vmem:[#allocation8 + $0x60] sm:$0xff]  ;;  %v1565_v41 = vld [vmem:[#allocation8 + $0x170] sm:$0xff]  ;;  %1613 = vmatpush.msrb.mxu1 %v1546_v47 }
 0x128   : > { %v1263_v8 = vmul.f32 %v2448_v62, %v968_v38  ;;  %v905_v46 = vsel %vm879_vm0, %v886_v51, %v904_v42  ;;  %1589 = vmatpush.msrb.mxu0 %v1531_v53  ;;  %v3171_v21 = vperm.slane %v2409_v39, 1  ;;  %v2728_v51 = vmul.f32 %v2498_v58, %v903_v14  ;;  %1633 = vmatpush.msrb.mxu2 %v1565_v41  ;;  %v1577_v39 = vld [vmem:[#allocation8 + $0x1d0] sm:$0xff] }
 0x129   : > { %v1169_v25 = vadd.f32 %v1161_v18, %v2540_v40  ;;  %v1209_v54 = vrot.slane %v2706_v56, 1  ;;  %v1220_v59 = vrot.slane %v1192_v19, 1  ;;  %v1280_v62 = vrot.slane %v2710_v35, 2  ;;  %v1530_v40 = vld [vmem:[#allocation8 + $0x58] sm:$0xff]  ;;  %v1524_v35 = vld [vmem:[#allocation8 + $0x28] sm:$0xff] }
 0x12a   : > { %v1291_v57 = vrot.slane %v1263_v8, 2  ;;  %v1162_v10 = vmul.f32 %v3171_v21, %v903_v14  ;;  %v1193_v38 = vmul.f32 %v2498_v58, %v969_v0  ;;  %v2735_v19 = vmul.f32 %v2503_v32, %v903_v14  ;;  %1590 = vmatpush.msrb.mxu0 %v1530_v40  ;;  %v1581_v58 = vld [vmem:[#allocation8 + $0x1f0] sm:$0xff] }
 0x12b   : > { %v1221_v18 = vsel %vm1037_vm1, %v1209_v54, %v1220_v59  ;;  %v1264_v8 = vmul.f32 %v2503_v32, %v969_v0  ;;  %v970_v53 = vsel %vm879_vm0, %v904_v42, 0.0  ;;  %v1212_v44 = vrot.slane %v2728_v51, 1  ;;  %1656 = vmatpush.msrb.mxu3 %v1581_v58  ;;  %v1529_v14 = vld [vmem:[#allocation8 + $0x50] sm:$0xff]  ;;  %v1564_v0 = vld [vmem:[#allocation8 + $0x168] sm:$0xff] }
 0x12c   : > { %v1170_v28 = vadd.f32 %v1162_v10, %v2582_v31  ;;  %v1318_v21 = vperm.slane %v2712_v20, 0  ;;  %v2745_v59 = vperm.slane %v2739_v48, 0  ;;  %v1545_v32 = vld [vmem:[#allocation8 + $0xd0] sm:$0xff]  ;;  %v1222_v42 = vrot.slane %v1193_v38, 1  ;;  %1591 = vmatpush.msrb.mxu0 %v1529_v14  ;;  %1634 = vmatpush.msrb.mxu2 %v1564_v0  ;;  %v1580_v31 = vld [vmem:[#allocation8 + $0x1e8] sm:$0xff]  ;;  %v1579_v14 = vld [vmem:[#allocation8 + $0x1e0] sm:$0xff] }
 0x12d   : > { %v1283_v55 = vrot.slane %v2735_v19, 2  ;;  %v1293_v40 = vrot.slane %v1264_v8, 2  ;;  %v1163_v41 = vmul.f32 %v1151_v36, %v905_v46  ;;  %v2750_v10 = vadd.f32 %v1221_v18, %v1169_v25  ;;  %1614 = vmatpush.msrb.mxu1 %v1545_v32  ;;  %v1528_v8 = vld [vmem:[#allocation8 + $0x48] sm:$0xff]  ;;  %1657 = vmatpush.msrb.mxu3 %v1580_v31  ;;  %v801_v19 = vpop.f32.mrf.mxu3 }
 0x12e   : > { %v2755_v47 = vsel %vm1109_vm2, %v1280_v62, %v1291_v57  ;;  %v2758_v58 = vmul.f32 %v2534_v16, %v905_v46  ;;  %v1194_v38 = vmul.f32 %v2534_v16, %v970_v53  ;;  %v1223_v36 = vsel %vm1037_vm1, %v1212_v44, %v1222_v42  ;;  %1592 = vmatpush.msrb.mxu0 %v1528_v8 }
 0x12f   : > { %v2765_v25 = vmul.f32 %v2626_v26, %v905_v46  ;;  %v2768_v18 = vmul.f32 %v2626_v26, %v970_v53  ;;  %v906_v57 = vrot.slane %v2697_v11, 7  ;;  %v2774_v16 = vsel %vm1109_vm2, %v1283_v55, %v1293_v40  ;;  %1615 = vmatpush.msrb.mxu1 %v1544_v63  ;;  %1635 = vmatpush.msrb.mxu2 %v1563_v5  ;;  %v1527_v46 = vld [vmem:[#allocation8 + $0x40] sm:$0xff]  ;;  %v1562_v53 = vld [vmem:[#allocation8 + $0x158] sm:$0xff] }
 0x130   : > { %v1171_v32 = vadd.f32 %v1163_v41, %v2592_v45  ;;  %v3153_v0 = vrot.slane %v2758_v58, 1  ;;  %v1224_v42 = vrot.slane %v1194_v38, 1  ;;  %v1543_v26 = vld [vmem:[#allocation8 + $0xc0] sm:$0xff]  ;;  %v2778_v3 = vadd.f32 %v1223_v36, %v1170_v28  ;;  %1658 = vmatpush.msrb.mxu3 %v1579_v14  ;;  %1593 = vmatpush.msrb.mxu0 %v1527_v46  ;;  %v1578_v45 = vld [vmem:[#allocation8 + $0x1d8] sm:$0xff]  ;;  %v1561_v38 = vld [vmem:[#allocation8 + $0x150] sm:$0xff]  ;;  %v755_v46 = vpop.f32.mrf.mxu1 }
 0x131   : > { %v907_v11 = vsel %vm879_vm0, %v887_v24, %v906_v57  ;;  %v971_v31 = vsel %vm879_vm0, %v906_v57, 0.0  ;;  %v815_v40 = vmax.f32 %v2701_v6, 0.0  ;;  %1616 = vmatpush.msrb.mxu1 %v1543_v26  ;;  %v1526_v24 = vld [vmem:[#allocation8 + $0x38] sm:$0xff]  ;;  %v1286_v6 = vrot.slane %v2765_v25, 2  ;;  %1636 = vmatpush.msrb.mxu2 %v1562_v53  ;;  %v1525_v26 = vld [vmem:[#allocation8 + $0x30] sm:$0xff]  ;;  %v1572_v25 = vld [vmem:[#allocation8 + $0x1a8] sm:$0xff] }
 0x132   : > { %v1225_v5 = vsel %vm1037_vm1, %v3153_v0, %v1224_v42  ;;  %v1164_v63 = vmul.f32 %v1152_v17, %v907_v11  ;;  %v2791_v28 = vmul.f32 %v2644_v2, %v907_v11  ;;  %v1195_v13 = vmul.f32 %v2644_v2, %v971_v31  ;;  %v1542_v41 = vld [vmem:[#allocation8 + $0xb8] sm:$0xff]  ;;  %1659 = vmatpush.msrb.mxu3 %v1578_v45  ;;  %v1559_v45 = vld [vmem:[#allocation8 + $0x140] sm:$0xff] }
 0x133   : > { %v1295_v8 = vrot.slane %v2768_v18, 2  ;;  %v2797_v36 = vmul.f32 %v2647_v9, %v907_v11  ;;  %v1266_v57 = vmul.f32 %v2647_v9, %v971_v31  ;;  %v2800_v17 = vadd.f32 %v1225_v5, %v1171_v32  ;;  %1594 = vmatpush.msrb.mxu0 %v1526_v24  ;;  %v1560_v18 = vld [vmem:[#allocation8 + $0x148] sm:$0xff]  ;;  %1617 = vmatpush.msrb.mxu1 %v1542_v41  ;;  %v1575_v5 = vld [vmem:[#allocation8 + $0x1c0] sm:$0xff] }
 0x134   : > { %v1218_v14 = vrot.slane %v2791_v28, 1  ;;  %v1226_v2 = vrot.slane %v1195_v13, 1  ;;  %v2803_v42 = vmin.f32 %v815_v40, 6.0  ;;  %v1172_v11 = vadd.f32 %v1164_v63, %v2601_v33  ;;  %v2817_v53 = vld [vmem:[#allocation7 + $0x20] ss:$8 sm:$0xf]  ;;  %1637 = vmatpush.msrb.mxu2 %v1561_v38  ;;  %1660 = vmatpush.msrb.mxu3 %v1577_v39 }
 0x135   : > { %v1289_v0 = vrot.slane %v2797_v36, 2  ;;  %v1210_v9 = vsel %vm1037_vm1, %v1208_v29, %v1209_v54  ;;  %v1281_v32 = vsel %vm1109_vm2, %v1279_v7, %v1280_v62  ;;  %v1576_v31 = vld [vmem:[#allocation8 + $0x1c8] sm:$0xff]  ;;  %v1297_v33 = vrot.slane %v1266_v57, 2  ;;  %v778_v29 = vpop.f32.mrf.mxu2  ;;  %1595 = vmatpush.msrb.mxu0 %v1525_v26  ;;  %1618 = vmatpush.msrb.mxu1 %v1541_v50  ;;  %v1522_v39 = vld [vmem:[#allocation8 + $0x18] sm:$0xff]  ;;  %v1519_v36 = vld [vmem:[#allocation8] sm:$0xff] }
 0x136   : > { %v888_v40 = vrot.slane %v2803_v42, 7  ;;  %v1236_v56 = vadd.f32 %v1210_v9, %v2603_v27  ;;  %v2822_v61 = vperm.slane %v2817_v53, 0  ;;  %v2827_v7 = vsel %vm1109_vm2, %v1286_v6, %v1295_v8  ;;  %1638 = vmatpush.msrb.mxu2 %v1560_v18  ;;  %1661 = vmatpush.msrb.mxu3 %v1576_v31  ;;  %v1557_v9 = vld [vmem:[#allocation8 + $0x130] sm:$0xff] }
 0x137   : > { %v1227_v54 = vsel %vm1037_vm1, %v1218_v14, %v1226_v2  ;;  %v516_v62 = vperm.slane %v2669_v52, 1  ;;  %v1213_v27 = vsel %vm1037_vm1, %v1211_v43, %v1212_v44  ;;  %v1284_v51 = vsel %vm1109_vm2, %v1282_v49, %v1283_v55  ;;  %1596 = vmatpush.msrb.mxu0 %v1524_v35  ;;  %v1539_v43 = vld [vmem:[#allocation8 + $0xa0] sm:$0xff]  ;;  %1619 = vmatpush.msrb.mxu1 %v1540_v12  ;;  %v1574_v49 = vld [vmem:[#allocation8 + $0x1b8] sm:$0xff] }
 0x138   : > { %v960_v63 = vsel %vm879_vm0, 0.0, %v888_v40  ;;  %v1307_v13 = vadd.f32 %v1281_v32, %v1236_v56  ;;  %v1237_v24 = vadd.f32 %v1213_v27, %v2639_v22  ;;  %v2857_v55 = vadd.f32 %v1227_v54, %v1172_v11  ;;  %1639 = vmatpush.msrb.mxu2 %v1559_v45  ;;  %1662 = vmatpush.msrb.mxu3 %v1575_v5  ;;  %v1538_v2 = vld [vmem:[#allocation8 + $0x98] sm:$0xff]  ;;  %v1573_v32 = vld [vmem:[#allocation8 + $0x1b0] sm:$0xff] }
 0x139   : > { %v1326_v50 = vmul.f32 %v1318_v21, %v960_v63  ;;  %v2850_v44 = vmul.f32 %v2745_v59, %v960_v63  ;;  %v2853_v41 = vmul.f32 %v2822_v61, %v960_v63  ;;  %v756_v22 = vadd.f32 %v755_v46, %v516_v62  ;;  %1597 = vmatpush.msrb.mxu0 %v1523_v60  ;;  %v1521_v45 = vld [vmem:[#allocation8 + $0x10] sm:$0xff] }
 0x13a   : > { %v2862_v38 = vsel %vm1109_vm2, %v1289_v0, %v1297_v33  ;;  %v2864_v8 = vadd.f32 %v1284_v51, %v1237_v24  ;;  %v1319_v57 = vperm.slane %v2712_v20, 1  ;;  %v2870_v18 = vperm.slane %v2739_v48, 1  ;;  %1620 = vmatpush.msrb.mxu1 %v1539_v43  ;;  %1640 = vmatpush.msrb.mxu2 %v1558_v1  ;;  %v1537_v5 = vld [vmem:[#allocation8 + $0x90] sm:$0xff]  ;;  %v1556_v24 = vld [vmem:[#allocation8 + $0x128] sm:$0xff] }
 0x13b   : > { %v2867_v46 = vadd.f32 %v1326_v50, %v1307_v13  ;;  %v816_v26 = vmax.f32 %v756_v22, 0.0  ;;  %v2873_v11 = vperm.slane %v2817_v53, 1  ;;  %v1377_v31 = vrot.slane %v2850_v44, 1  ;;  %1663 = vmatpush.msrb.mxu3 %v1574_v49  ;;  %1598 = vmatpush.msrb.mxu0 %v1522_v39  ;;  %v735_v50 = vpop.f32.mrf.mxu0  ;;  %v1520_v22 = vld [vmem:[#allocation8 + $0x8] sm:$0xff] }
 0x13c   : > { %v517_v33 = vperm.slane %v2669_v52, 2  ;;  %v3172_v56 = vrot.slane %v2758_v58, 1  ;;  %v3173_v35 = vrot.slane %v2661_v15, 1  ;;  %v3174_v54 = vrot.slane %v2664_v23, 2  ;;  %1621 = vmatpush.msrb.mxu1 %v1538_v2  ;;  %1641 = vmatpush.msrb.mxu2 %v1557_v9  ;;  %v1536_v1 = vld [vmem:[#allocation8 + $0x88] sm:$0xff]  ;;  %v1571_v2 = vld [vmem:[#allocation8 + $0x1a0] sm:$0xff] }
 0x13d   : > { %v1448_v63 = vrot.slane %v2853_v41, 2  ;;  %v2888_v13 = vmin.f32 %v816_v26, 6.0  ;;  %v1320_v15 = vperm.slane %v2712_v20, 2  ;;  %v2893_v23 = vperm.slane %v2739_v48, 2  ;;  %1664 = vmatpush.msrb.mxu3 %v1573_v32  ;;  %1599 = vmatpush.msrb.mxu0 %v1521_v45  ;;  %v1570_v45 = vld [vmem:[#allocation8 + $0x198] sm:$0xff] }
 0x13e   : > { %v1216_v12 = vsel %vm1037_vm1, %v3173_v35, %v3172_v56  ;;  %v1287_v27 = vsel %vm1109_vm2, %v3174_v54, %v1286_v6  ;;  %v779_v51 = vadd.f32 %v778_v29, %v517_v33  ;;  %v518_v6 = vperm.slane %v2669_v52, 3  ;;  %1622 = vmatpush.msrb.mxu1 %v1537_v5  ;;  %v781_v35 = vpop.f32.mrf.mxu2  ;;  %1642 = vmatpush.msrb.mxu2 %v1556_v24 }
 0x13f   : > { %v1238_v58 = vadd.f32 %v1216_v12, %v2673_v34  ;;  %v3175_v60 = vrot.slane %v2681_v4, 1  ;;  %v758_v34 = vpop.f32.mrf.mxu1  ;;  %v889_v49 = vrot.slane %v2888_v13, 7  ;;  %v2905_v39 = vperm.slane %v2817_v53, 2  ;;  %1665 = vmatpush.msrb.mxu3 %v1572_v25  ;;  %v1535_v12 = vld [vmem:[#allocation8 + $0x80] sm:$0xff]  ;;  %1600 = vmatpush.msrb.mxu0 %v1520_v22 }
 0x140   : > { %v3176_v28 = vrot.slane %v2684_v30, 2  ;;  %v817_v26 = vmax.f32 %v779_v51, 0.0  ;;  %v802_v9 = vadd.f32 %v801_v19, %v518_v6  ;;  %v1321_v56 = vperm.slane %v2712_v20, 3  ;;  %1623 = vmatpush.msrb.mxu1 %v1536_v1  ;;  %v1554_v19 = vld [vmem:[#allocation8 + $0x118] sm:$0xff] }
 0x141   : > { %v1219_v43 = vsel %vm1037_vm1, %v3175_v60, %v1218_v14  ;;  %v2902_v29 = vadd.f32 %v1287_v27, %v1238_v58  ;;  %v1555_v14 = vld [vmem:[#allocation8 + $0x120] sm:$0xff]  ;;  %v961_v30 = vsel %vm879_vm0, 0.0, %v889_v49  ;;  %v3177_v54 = vperm.slane %v2669_v52, 0  ;;  %1666 = vmatpush.msrb.mxu3 %v1571_v2  ;;  %1601 = vmatpush.msrb.mxu0 %v1519_v36  ;;  %v1552_v36 = vld [vmem:[#allocation8 + $0x108] sm:$0xff] }
 0x142   : > { %v1290_v4 = vsel %vm1109_vm2, %v3176_v28, %v1289_v0  ;;  %v1239_v32 = vadd.f32 %v1219_v43, %v2689_v37  ;;  %v2920_v0 = vperm.slane %v2739_v48, 3  ;;  %v759_v37 = vadd.f32 %v758_v34, %v516_v62  ;;  %1643 = vmatpush.msrb.mxu2 %v1555_v14  ;;  %v804_v43 = vpop.f32.mrf.mxu3  ;;  %1624 = vmatpush.msrb.mxu1 %v1535_v12  ;;  %v1569_v34 = vld [vmem:[#allocation8 + $0x190] sm:$0xff]  ;;  %v2943_v14 = vld [vmem:[#allocation10 + $0xc] sm:$0xf] }
 0x143   : > { %v736_v27 = vadd.f32 %v735_v50, %v3177_v54  ;;  %v1327_v5 = vmul.f32 %v1319_v57, %v961_v30  ;;  %v2929_v58 = vmul.f32 %v2870_v18, %v961_v30  ;;  %v2932_v24 = vmul.f32 %v2873_v11, %v961_v30  ;;  %v1553_v50 = vld [vmem:[#allocation8 + $0x110] sm:$0xff]  ;;  %1667 = vmatpush.msrb.mxu3 %v1570_v45  ;;  %v1568_v12 = vld [vmem:[#allocation8 + $0x188] sm:$0xff] }
 0x144   : > { %v2934_v48 = vmin.f32 %v817_v26, 6.0  ;;  %v818_v25 = vmax.f32 %v802_v9, 0.0  ;;  %v828_v62 = vmax.f32 %v759_v37, 0.0  ;;  %v782_v60 = vadd.f32 %v781_v35, %v517_v33  ;;  %1644 = vmatpush.msrb.mxu2 %v1554_v19  ;;  %v1551_v19 = vld [vmem:[#allocation8 + $0x100] sm:$0xff] }
 0x145   : > { %v827_v51 = vmax.f32 %v736_v27, 0.0  ;;  %v2937_v22 = vadd.f32 %v1327_v5, %v2864_v8  ;;  %v1310_v28 = vadd.f32 %v1290_v4, %v1239_v32  ;;  %v2941_v26 = vperm.slane %v2817_v53, 3  ;;  %1668 = vmatpush.msrb.mxu3 %v1569_v34 }
 0x146   : > { %v890_v1 = vrot.slane %v2934_v48, 7  ;;  %v2945_v2 = vmin.f32 %v818_v25, 6.0  ;;  %v852_v9 = vmin.f32 %v828_v62, 6.0  ;;  %v829_v35 = vmax.f32 %v782_v60, 0.0  ;;  %1645 = vmatpush.msrb.mxu2 %v1553_v50 }
 0x147   : > { %v851_v33 = vmin.f32 %v827_v51, 6.0  ;;  %v1380_v8 = vrot.slane %v2929_v58, 1  ;;  %v1451_v30 = vrot.slane %v2932_v24, 2  ;;  %v805_v4 = vadd.f32 %v804_v43, %v518_v6  ;;  %1669 = vmatpush.msrb.mxu3 %v1568_v12  ;;  %v1567_v6 = vld [vmem:[#allocation8 + $0x180] sm:$0xff] }
 0x148   : > { %v962_v53 = vsel %vm879_vm0, 0.0, %v890_v1  ;;  %v891_v27 = vrot.slane %v2945_v2, 7  ;;  %v1486_v37 = vperm.slane %v2943_v14, 0  ;;  %v910_v25 = vrot.slane %v852_v9, 7  ;;  %1646 = vmatpush.msrb.mxu2 %v1552_v36 }
 0x149   : > { %v1328_v32 = vmul.f32 %v1320_v15, %v962_v53  ;;  %v2957_v54 = vmul.f32 %v2893_v23, %v962_v53  ;;  %v2962_v45 = vmul.f32 %v2905_v39, %v962_v53  ;;  %v908_v5 = vrot.slane %v851_v33, 7  ;;  %1670 = vmatpush.msrb.mxu3 %v1567_v6 }
 0x14a   : > { %v1487_v52 = vperm.slane %v2943_v14, 1  ;;  %v963_v62 = vsel %vm879_vm0, 0.0, %v891_v27  ;;  %v853_v60 = vmin.f32 %v829_v35, 6.0  ;;  %v830_v43 = vmax.f32 %v805_v4, 0.0  ;;  %1647 = vmatpush.msrb.mxu2 %v1551_v19 }
 0x14b   : > { %v2966_v51 = vadd.f32 %v1328_v32, %v2902_v29  ;;  %v1329_v50 = vmul.f32 %v1321_v56, %v963_v62  ;;  %v2972_v34 = vmul.f32 %v2920_v0, %v963_v62  ;;  %v2975_v2 = vmul.f32 %v2941_v26, %v963_v62 }
 0x14c   : > { %v909_v33 = vsel %vm879_vm0, %v888_v40, %v908_v5  ;;  %v1383_v29 = vrot.slane %v2957_v54, 1  ;;  %v972_v9 = vsel %vm879_vm0, %v908_v5, 0.0  ;;  %v1454_v12 = vrot.slane %v2962_v45, 2 }
 0x14d   : > { %v2983_v35 = vmul.f32 %v2745_v59, %v909_v33  ;;  %v2986_v36 = vmul.f32 %v2822_v61, %v909_v33  ;;  %v1337_v53 = vadd.f32 %v1329_v50, %v1310_v28  ;;  %v2991_v42 = vmul.f32 %v1318_v21, %v909_v33 }
 0x14e   : > { %v2994_v40 = vmul.f32 %v2745_v59, %v972_v9  ;;  %v1386_v4 = vrot.slane %v2972_v34, 1  ;;  %v2999_v54 = vmul.f32 %v2822_v61, %v972_v9  ;;  %v911_v19 = vsel %vm879_vm0, %v889_v49, %v910_v25 }
 0x14f   : > { %v1378_v32 = vrot.slane %v2983_v35, 1  ;;  %v1457_v28 = vrot.slane %v2975_v2, 2  ;;  %v1449_v45 = vrot.slane %v2986_v36, 2  ;;  %v973_v21 = vsel %vm879_vm0, %v910_v25, 0.0 }
 0x150   : > { %v3008_v59 = vmul.f32 %v2870_v18, %v911_v19  ;;  %v1389_v5 = vrot.slane %v2994_v40, 1  ;;  %v3013_v6 = vmul.f32 %v1319_v57, %v911_v19  ;;  %v3016_v61 = vmul.f32 %v2870_v18, %v973_v21 }
 0x151   : > { %v3019_v13 = vmul.f32 %v2873_v11, %v911_v19  ;;  %v1460_v49 = vrot.slane %v2999_v54, 2  ;;  %v912_v62 = vrot.slane %v853_v60, 7  ;;  %v854_v50 = vmin.f32 %v830_v43, 6.0 }
 0x152   : > { %v1379_v25 = vsel %vm1037_vm1, %v1377_v31, %v1378_v32  ;;  %v1381_v34 = vrot.slane %v3008_v59, 1  ;;  %v1391_v57 = vrot.slane %v3016_v61, 1  ;;  %v1433_v18 = vmul.f32 %v2873_v11, %v973_v21 }
 0x153   : > { %v1405_v2 = vadd.f32 %v1379_v25, %v2867_v46  ;;  %v1452_v33 = vrot.slane %v3019_v13, 2  ;;  %v913_v60 = vsel %vm879_vm0, %v890_v1, %v912_v62  ;;  %v974_v43 = vsel %vm879_vm0, %v912_v62, 0.0 }
 0x154   : > { %v914_v9 = vrot.slane %v854_v50, 7  ;;  %v1359_v44 = vmul.f32 %v2893_v23, %v913_v60  ;;  %v1363_v31 = vmul.f32 %v2893_v23, %v974_v43  ;;  %v3039_v40 = vmul.f32 %v2905_v39, %v913_v60 }
 0x155   : > { %v1450_v46 = vsel %vm1109_vm2, %v1448_v63, %v1449_v45  ;;  %v3047_v11 = vmul.f32 %v2905_v39, %v974_v43  ;;  %v1462_v19 = vrot.slane %v1433_v18, 2  ;;  %v1332_v23 = vmul.f32 %v1320_v15, %v913_v60 }
 0x156   : > { %v915_v48 = vsel %vm879_vm0, %v891_v27, %v914_v9  ;;  %v975_v1 = vsel %vm879_vm0, %v914_v9, 0.0  ;;  %v1476_v54 = vadd.f32 %v1450_v46, %v1405_v2  ;;  %v1384_v21 = vrot.slane %v1359_v44, 1 }
 0x157   : > { %v1393_v59 = vrot.slane %v1363_v31, 1  ;;  %v1455_v61 = vrot.slane %v3039_v40, 2  ;;  %v1360_v41 = vmul.f32 %v2920_v0, %v915_v48  ;;  %v1364_v63 = vmul.f32 %v2920_v0, %v975_v1 }
 0x158   : > { %v3057_v39 = vmul.f32 %v2941_v26, %v915_v48  ;;  %v1333_v27 = vmul.f32 %v1321_v56, %v915_v48  ;;  %v1494_v13 = vadd.f32 %v1486_v37, %v1476_v54  ;;  %v1382_v15 = vsel %vm1037_vm1, %v1380_v8, %v1381_v34 }
 0x159   : > { %v1453_v62 = vsel %vm1109_vm2, %v1451_v30, %v1452_v33  ;;  %v1464_v50 = vrot.slane %v3047_v11, 2  ;;  %v1387_v0 = vrot.slane %v1360_v41, 1  ;;  %v1406_v18 = vadd.f32 %v1382_v15, %v2937_v22 }
 0x15a   : > { %v1458_v25 = vrot.slane %v3057_v39, 2  ;;  %v1395_v20 = vrot.slane %v1364_v63, 1  ;;  %v1435_v56 = vmul.f32 %v2941_v26, %v975_v1  ;;  %v1502_v2 = vmax.f32 %v1494_v13, 0.0 }
 0x15b   : > { %v1385_v60 = vsel %vm1037_vm1, %v1383_v29, %v1384_v21  ;;  %v1477_v58 = vadd.f32 %v1453_v62, %v1406_v18  ;;  %v1488_v24 = vperm.slane %v2943_v14, 2  ;;  %v1388_v30 = vsel %vm1037_vm1, %v1386_v4, %v1387_v0 }
 0x15c   : > { %v1407_v8 = vadd.f32 %v1385_v60, %v2966_v51  ;;  %v1510_v43 = vmin.f32 %v1502_v2, 6.0  ;;  %v1456_v9 = vsel %vm1109_vm2, %v1454_v12, %v1455_v61  ;;  %v1408_v44 = vadd.f32 %v1388_v30, %v1337_v53 }
 0x15d   : > { %v1489_v31 = vperm.slane %v2943_v14, 3  ;;  %v1495_v22 = vadd.f32 %v1487_v52, %v1477_v58  ;;  %v1459_v40 = vsel %vm1109_vm2, %v1457_v28, %v1458_v25  ;;  %v1311_v29 = vadd.f32 %v2755_v47, %v2750_v10 }
 0x15e   : > { %v1478_v26 = vadd.f32 %v1456_v9, %v1407_v8  ;;  %1602 = vmatmul.f32.vlgmr.msrb.gmra.mxu0 %v1510_v43  ;;  %v1479_v51 = vadd.f32 %v1459_v40, %v1408_v44  ;;  %v1390_v4 = vsel %vm1037_vm1, %v1378_v32, %v1389_v5  ;;  %v1461_v12 = vsel %vm1109_vm2, %v1449_v45, %v1460_v49  ;;  %v1929_v43 = vld [vmem:[%s2325_s28] sm:$0xff] }
 0x15f   : > { %v1312_v53 = vadd.f32 %v2774_v16, %v2778_v3  ;;  %v1503_v46 = vmax.f32 %v1495_v22, 0.0  ;;  %v1338_v28 = vadd.f32 %v2991_v42, %v1311_v29  ;;  %v1392_v48 = vsel %vm1037_vm1, %v1381_v34, %v1391_v57 }
 0x160   : > { %v1496_v11 = vadd.f32 %v1488_v24, %v1478_v26  ;;  %v1497_v10 = vadd.f32 %v1489_v31, %v1479_v51  ;;  %v1463_v35 = vsel %vm1109_vm2, %v1452_v33, %v1462_v19  ;;  %v1313_v32 = vadd.f32 %v2827_v7, %v2800_v17  ;;  %v1930_v51 = vld [vmem:[%s2325_s28 + $0x8] sm:$0xff] }
 0x161   : > { %v1339_v47 = vadd.f32 %v3013_v6, %v1312_v53  ;;  %v1511_v36 = vmin.f32 %v1503_v46, 6.0  ;;  %v1409_v45 = vadd.f32 %v1390_v4, %v1338_v28  ;;  %v1394_v49 = vsel %vm1037_vm1, %v1384_v21, %v1393_v59 }
 0x162   : > { %v1504_v5 = vmax.f32 %v1496_v11, 0.0  ;;  %v1505_v3 = vmax.f32 %v1497_v10, 0.0  ;;  %v1340_v1 = vadd.f32 %v1332_v23, %v1313_v32  ;;  %v1314_v42 = vadd.f32 %v2862_v38, %v2857_v55 }
 0x163   : > { %v1410_v16 = vadd.f32 %v1392_v48, %v1339_v47  ;;  %v1466_v34 = vrot.slane %v1435_v56, 2  ;;  %1625 = vmatmul.f32.vlgmr.msrb.gmra.mxu1 %v1511_v36  ;;  %v1480_v6 = vadd.f32 %v1461_v12, %v1409_v45  ;;  %v1396_v33 = vsel %vm1037_vm1, %v1387_v0, %v1395_v20 }
 0x164   : > { %v1512_v57 = vmin.f32 %v1504_v5, 6.0  ;;  %v1513_v54 = vmin.f32 %v1505_v3, 6.0  ;;  %v1411_v17 = vadd.f32 %v1394_v49, %v1340_v1  ;;  %v1341_v7 = vadd.f32 %v1333_v27, %v1314_v42 }
 0x165   : > { %v1481_v19 = vadd.f32 %v1463_v35, %v1410_v16  ;;  %v1498_v21 = vadd.f32 %v1486_v37, %v1480_v6  ;;  %v1465_v59 = vsel %vm1109_vm2, %v1455_v61, %v1464_v50  ;;  %v1467_v63 = vsel %vm1109_vm2, %v1458_v25, %v1466_v34 }
 0x166   : > { %1648 = vmatmul.f32.vlgmr.msrb.gmra.mxu2 %v1512_v57  ;;  %1671 = vmatmul.f32.vlgmr.msrb.gmra.mxu3 %v1513_v54  ;;  %v1482_v38 = vadd.f32 %v1465_v59, %v1411_v17  ;;  %v1412_v23 = vadd.f32 %v1396_v33, %v1341_v7 }
 0x167   : > { %v1499_v55 = vadd.f32 %v1487_v52, %v1481_v19  ;;  %v1506_v41 = vmax.f32 %v1498_v21, 0.0  ;;  %v1928_v52 = vld [vmem:[#allocation10 + $0x10] ss:$0 sm:$0xff] }
 0x168   : > { %v1500_v13 = vadd.f32 %v1488_v24, %v1482_v38  ;;  %v1483_v15 = vadd.f32 %v1467_v63, %v1412_v23 }
 0x169   : > { %v1507_v39 = vmax.f32 %v1499_v55, 0.0  ;;  %v1514_v62 = vmin.f32 %v1506_v41, 6.0 }
 0x16a   : > { %v1508_v0 = vmax.f32 %v1500_v13, 0.0  ;;  %v1501_v18 = vadd.f32 %v1489_v31, %v1483_v15 }
 0x16b   : > { %v1515_v27 = vmin.f32 %v1507_v39, 6.0  ;;  %1605 = vmatmul.f32.gmra.mxu0 %v1514_v62 }
 0x16c   : > { %v1516_v37 = vmin.f32 %v1508_v0, 6.0  ;;  %v1509_v61 = vmax.f32 %v1501_v18, 0.0 }
 0x16d   : > { %1628 = vmatmul.f32.gmra.mxu1 %v1515_v27 }
 0x16e   : > { %1651 = vmatmul.f32.gmra.mxu2 %v1516_v37  ;;  %v1517_v14 = vmin.f32 %v1509_v61, 6.0 }
 0x170   : > { %1674 = vmatmul.f32.gmra.mxu3 %v1517_v14 }
 0x1db   : > { %v1603_v50 = vpop.f32.mrf.mxu0 }
 0x1dc   : > { %v1604_v25 = vadd.f32 %v1928_v52, %v1603_v50 }
 0x1e0   : > { %v1626_v20 = vpop.f32.mrf.mxu1 }
 0x1e1   : > { %v1627_v56 = vadd.f32 %v1626_v20, %v1604_v25 }
 0x1e8   : > { %v1606_v60 = vpop.f32.mrf.mxu0 }
 0x1e9   : > { %v1649_v2 = vpop.f32.mrf.mxu2  ;;  %v1672_v8 = vpop.f32.mrf.mxu3  ;;  %v1607_v30 = vadd.f32 %v1928_v52, %v1606_v60 }
 0x1ea   : > { %v1650_v58 = vadd.f32 %v1649_v2, %v1627_v56  ;;  %v1629_v44 = vpop.f32.mrf.mxu1 }
 0x1eb   : > { %v1630_v31 = vadd.f32 %v1629_v44, %v1607_v30 }
 0x1ec   : > { %v1673_v24 = vadd.f32 %v1672_v8, %v1650_v58 }
 0x1ee   : > { %v1678_v9 = vadd.f32 %v1929_v43, %v1673_v24 }
 0x1f0   : > { %1680 = vst [vmem:[%s308_s29] sm:$0xff] %v1678_v9 }
 0x1f1   : > { %v1652_v22 = vpop.f32.mrf.mxu2 }
 0x1f2   : > { %v1653_v26 = vadd.f32 %v1652_v22, %v1630_v31 }
 0x1f3   : > { %v1675_v40 = vpop.f32.mrf.mxu3 }
 0x1f4   : > { %v1676_v29 = vadd.f32 %v1675_v40, %v1653_v26 }
 0x1f6   : > { %v1679_v4 = vadd.f32 %v1930_v51, %v1676_v29 }
 0x1f8   : > { %1681 = vst [vmem:[%s308_s29 + $0x8] sm:$0xff] %v1679_v4 }
 0x1f9   : > { %2108 = shalt.err (!%p2105_p10)
}
 0x1fa   : > { %s2167_s9 = smov 128   ;;  %s2168_s28 = smov 8  }
 0x1fb   : > { %1851 = dma.vmem_to_hbm [thread:$0]  (%p2286_p3), %s1696_s12, 256, %s1698_s14, %s1683_s22, %s2167_s9, %s2167_s9, %s2168_s28  }
 0x1fc PF: > { %s1712_s24 = sand.u32 1, %s2143_s18   ;;  %p3178_p12 = scmp.ge.s32.totalorder %s2155_s21, 2 }
 0x1fd   : > { %s1713_s29 = scalar_lea.sflag [#allocation4], %s1712_s24 }
 0x1fe   : > { %p1871_p13 = pnand %p3178_p12, %p2234_p6 }
 0x200   : > { %p1872_p0 = pneg %p1871_p13 }
 0x202   : > { %2138 = dma.done.wait (%p1872_p0), %s1713_s29, 256  }
 0x203   : > { %2140 = vsyncadd (%p1872_p0), %s1713_s29, 4294967040  ;;  %p20_p5 = scmp.ge.s32.totalorder %s2276_s13, 4   ;;  %s3179_s18 = smov %s2147_s19 }
 0x204   : > { %s3180_s19 = smov %s2151_s20  ;;  %s3181_s20 = smov %s2292_s26 }
 0x205   : > { %s3182_s21 = smov %s2276_s13  ;;  %22 = sbr.rel (!%p20_p5) target bundleno = 7 (0x7), region = 109 }
 0x20a   :  { %1719 = vsyncpa [#allocation3], 1 }
 0x20b   :  { %1721 = vsyncpa [#allocation3 + $0x1], 1 }
 0x20c   :  { %1722 = vsyncpa [#allocation6], 1 }
 0x20d   :  { %1723 = vsyncpa [#allocation9], 1 }
 0x20e   :  { %1724 = vsyncpa [#allocation4], 1 }
 0x20f   :  { %1726 = vsyncpa [#allocation4 + $0x1], 1 }

</bundles_post_ra>
